<compile_context>
chip_gen: v7x
topology: tpu7x:2x2x1
jax: 0.10.0
libtpu: 0.0.40
codegen_flags: <defaults>
</compile_context>

<pallas_src>
import functools

import jax
import jax.numpy as jnp
import numpy as np
from jax.experimental import pallas as pl
from jax.experimental.pallas import tpu as pltpu

EPS_BN = 1e-5


def light_attention_kernel(xp_ref, wc_ref, cb_ref, w1a_ref, w1b_ref, b1_ref,
                           w2_ref, b2_ref, out_ref, *, L, K, E):
    """One batch tile (TB elements) per grid step.

    xp_ref : (TB, L+K-1, E) bf16  zero-padded input slab (halo + batch tail pad)
    wc_ref : (K, E, 2E)     bf16  fused conv weights, wc[k, i, o] = torch_w[o, i, k]
                                  (columns [0,E) feature conv, [E,2E) attention conv)
    cb_ref : (1, 2E)        f32   fused conv biases
    w1a/w1b: (E, H)         f32   Linear(2E, H) split into the o1 / o2 halves
    b1     : (1, H)         f32
    w2     : (H, O)         f32   output Linear with eval-BatchNorm folded in
    b2     : (1, O)         f32
    out_ref: (1, TB, O)     f32
    """
    TB = xp_ref.shape[0]
    xp = xp_ref[...]                                   # (TB, Lp, E) bf16

    # Both Conv1d's ("same" padding) at once: K shifted windows, each flattened to
    # (TB*L, E) rows, hit the fused (E, 2E) weight slab on the MXU (bf16 in, f32 acc).
    acc = jnp.zeros((TB * L, 2 * E), jnp.float32)
    for k in range(K):                                 # K is small & static -> unrolled
        win = xp[:, k:k + L, :].reshape(TB * L, E)
        acc = acc + jnp.dot(win, wc_ref[k], preferred_element_type=jnp.float32)
    y = (acc + cb_ref[...]).reshape(TB, L, 2 * E)      # add fused conv bias

    feat = y[:, :, :E]                                 # (TB, L, E)  feature conv out
    att = y[:, :, E:]                                  # (TB, L, E)  attention conv out

    # softmax over the sequence axis (== torch dim=-1 of the [B, E, L] conv output)
    att = att - jnp.max(att, axis=1, keepdims=True)
    p = jnp.exp(att)
    p = p * pl.reciprocal(jnp.sum(p, axis=1, keepdims=True), approx=True)

    o1 = jnp.sum(feat * p, axis=1)                     # (TB, E)
    o2 = jnp.max(feat, axis=1)                         # (TB, E)

    # Linear(2E -> H): cat([o1, o2]) @ W1 == o1 @ W1[:E] + o2 @ W1[E:]
    h = (jnp.dot(o1, w1a_ref[...], preferred_element_type=jnp.float32)
         + jnp.dot(o2, w1b_ref[...], preferred_element_type=jnp.float32)
         + b1_ref[...])
    h = jnp.maximum(h, 0.0)                            # ReLU (dropouts: identity at inference)
    # BatchNorm1d (eval mode) is folded into w2/b2 on the host.
    out = jnp.dot(h, w2_ref[...], preferred_element_type=jnp.float32) + b2_ref[...]
    out_ref[0] = out                                   # (TB, O) block store


def _prepare_operands(params):
    """Host-side, inference-time-constant weight fusion / BN folding."""
    E = params["feat_b"].shape[0]
    # Fused conv weights: wc[k, i, o] multiplies x[l + k - K//2, i].
    wf = jnp.transpose(params["feat_w"], (2, 1, 0))    # (K, E_in, E_out)
    wa = jnp.transpose(params["att_w"], (2, 1, 0))
    wc = jnp.concatenate([wf, wa], axis=-1).astype(jnp.bfloat16)        # (K, E, 2E)
    cb = jnp.concatenate([params["feat_b"], params["att_b"]])[None, :]  # (1, 2E)

    w1 = params["lin_w"].T                             # (2E, H)
    w1a, w1b = w1[:E], w1[E:]
    b1 = params["lin_b"][None, :]

    # Fold eval-mode BatchNorm1d into the output Linear:
    #   BN(h) = h*s + (beta - mean*s),  s = gamma * rsqrt(var + eps)
    #   BN(h) @ W2 + b2 = h @ (s[:,None]*W2) + ((beta - mean*s) @ W2 + b2)
    s = params["gamma"] * jax.lax.rsqrt(params["var"] + EPS_BN)         # (H,)
    w2 = params["out_w"].T * s[:, None]                                 # (H, O)
    b2 = (params["out_b"]
          + (params["beta"] - params["mean"] * s) @ params["out_w"].T)[None, :]
    return wc, cb, w1a, w1b, b1, w2, b2


def light_attention(x, params, *, block_b=8):
    """x: [B, L, E] float32 -> logits [B, output_dim] (inference semantics)."""
    B, L, E = x.shape
    K = params["feat_w"].shape[-1]
    pad = K // 2
    Lp = L + 2 * pad
    H = params["lin_b"].shape[0]
    O = params["out_b"].shape[0]
    assert L % 8 == 0, "sequence length must be a multiple of the sublane tile (8)"

    TB = min(block_b, B)
    nb = pl.cdiv(B, TB)
    Bp = nb * TB

    wc, cb, w1a, w1b, b1, w2, b2 = _prepare_operands(params)

    # Conv "same" halo + batch-tile tail zero padding (padded rows discarded below;
    # zeros stay finite through softmax/max so no masking is needed).
    xp = jnp.pad(x, ((0, Bp - B), (pad, pad), (0, 0))).astype(jnp.bfloat16)

    def full(shape):
        return pl.BlockSpec(shape, lambda b: (0,) * len(shape))

    kernel = functools.partial(light_attention_kernel, L=L, K=K, E=E)

    out = pl.pallas_call(
        kernel,
        out_shape=jax.ShapeDtypeStruct((nb, TB, O), jnp.float32),
        grid=(nb,),
        in_specs=[
            pl.BlockSpec((TB, Lp, E), lambda b: (b, 0, 0)),  # batch tile of padded input
            full((K, E, 2 * E)),                             # fused conv weights (bf16)
            full((1, 2 * E)),                                # fused conv bias
            full((E, H)), full((E, H)), full((1, H)),        # Linear(2E, H)
            full((H, O)), full((1, O)),                      # output Linear (BN folded)
        ],
        out_specs=pl.BlockSpec((1, TB, O), lambda b: (b, 0, 0)),
        compiler_params=pltpu.CompilerParams(
            dimension_semantics=("parallel",)),
    )(xp, wc, cb, w1a, w1b, b1, w2, b2)
    return out.reshape(Bp, O)[:B]


def reference(x, params):
    """Pure-JAX reference (lax.conv as an independent conv implementation).

    Conv inputs are rounded to bf16 to mirror the kernel's bf16 MXU path
    (accumulation stays f32); everything downstream is plain f32.
    """
    K = params["feat_w"].shape[-1]
    pad = K // 2
    xb = x.astype(jnp.bfloat16).astype(jnp.float32)
    x_ncl = jnp.transpose(xb, (0, 2, 1))               # [B, E, L] (torch conv layout)

    def conv(w, b):
        wb = w.astype(jnp.bfloat16).astype(jnp.float32)          # (E_out, E_in, K)
        y = jax.lax.conv_general_dilated(
            x_ncl, wb, window_strides=(1,), padding=[(pad, pad)],
            dimension_numbers=("NCH", "OIH", "NCH"),
            precision=jax.lax.Precision.HIGHEST)
        return y + b[None, :, None]

    o = conv(params["feat_w"], params["feat_b"])
    att = conv(params["att_w"], params["att_b"])
    p = jax.nn.softmax(att, axis=-1)
    o1 = jnp.sum(o * p, axis=-1)
    o2 = jnp.max(o, axis=-1)
    oc = jnp.concatenate([o1, o2], axis=-1)            # [B, 2E]
    h = oc @ params["lin_w"].T + params["lin_b"]
    h = jnp.maximum(h, 0.0)
    h = ((h - params["mean"]) / jnp.sqrt(params["var"] + EPS_BN)
         * params["gamma"] + params["beta"])
    return h @ params["out_w"].T + params["out_b"]


def make_params(key, E, K, H, O):
    """Parameters in the PyTorch module's native layouts."""
    ks = jax.random.split(key, 12)
    s = 0.05
    return {
        "feat_w": s * jax.random.normal(ks[0], (E, E, K), jnp.float32),   # Conv1d weight
        "feat_b": s * jax.random.normal(ks[1], (E,), jnp.float32),
        "att_w": s * jax.random.normal(ks[2], (E, E, K), jnp.float32),
        "att_b": s * jax.random.normal(ks[3], (E,), jnp.float32),
        "lin_w": s * jax.random.normal(ks[4], (H, 2 * E), jnp.float32),   # Linear(2E, H)
        "lin_b": s * jax.random.normal(ks[5], (H,), jnp.float32),
        "gamma": 1.0 + 0.1 * jax.random.normal(ks[6], (H,), jnp.float32),
        "beta": 0.1 * jax.random.normal(ks[7], (H,), jnp.float32),
        "mean": 0.1 * jax.random.normal(ks[8], (H,), jnp.float32),
        "var": 1.0 + 0.1 * jnp.abs(jax.random.normal(ks[9], (H,), jnp.float32)),
        "out_w": s * jax.random.normal(ks[10], (O, H), jnp.float32),      # Linear(H, O)
        "out_b": jnp.zeros((O,), jnp.float32),
    }


if __name__ == "__main__":
    # Small shapes consistent with the module: embeddings_dim=E, kernel_size=9,
    # hidden=32 (fixed by the module), output_dim=1.  B=16 with batch tile TB=8
    # gives a 2-step "parallel" grid and 128-row conv matmuls.
    B, L, E, K, H, O = 16, 16, 32, 9, 32, 1

    key = jax.random.PRNGKey(0)
    k_x, k_p = jax.random.split(key)
    x = jax.random.normal(k_x, (B, L, E), jnp.float32)   # [batch, seq, emb]
    params = make_params(k_p, E, K, H, O)

    out = jax.block_until_ready(light_attention(x, params, block_b=8))
    ref = jax.block_until_ready(reference(x, params))

    np.testing.assert_allclose(np.asarray(out), np.asarray(ref), rtol=2e-3, atol=2e-3)
    assert out.shape == (B, O)
    print("KERNEL_OK")
</pallas_src>

<mosaic_0001>
module attributes {stable_mosaic.version = 11 : i64} {
  func.func @light_attention_kernel(%arg0: i32, %arg1: memref<8x24x32xbf16, #tpu.memory_space<vmem>>, %arg2: memref<9x32x64xbf16, #tpu.memory_space<vmem>>, %arg3: memref<1x64xf32, #tpu.memory_space<vmem>>, %arg4: memref<32x32xf32, #tpu.memory_space<vmem>>, %arg5: memref<32x32xf32, #tpu.memory_space<vmem>>, %arg6: memref<1x32xf32, #tpu.memory_space<vmem>>, %arg7: memref<32x1xf32, #tpu.memory_space<vmem>>, %arg8: memref<1x1xf32, #tpu.memory_space<vmem>>, %arg9: memref<1x8x1xf32, #tpu.memory_space<vmem>>) attributes {dimension_semantics = [#tpu.dimension_semantics<parallel>], iteration_bounds = array<i64: 2>, scalar_prefetch = 0 : i64, scratch_operands = 0 : i64, tpu.core_type = #tpu.core_type<tc>, window_params = [{transform_indices = @transform_0, window_bounds = array<i64: 8, 24, 32>}, {pipeline_mode = #tpu.pipeline_mode<synchronous>, transform_indices = @transform_1, window_bounds = array<i64: 9, 32, 64>}, {pipeline_mode = #tpu.pipeline_mode<synchronous>, transform_indices = @transform_2, window_bounds = array<i64: 1, 64>}, {pipeline_mode = #tpu.pipeline_mode<synchronous>, transform_indices = @transform_3, window_bounds = array<i64: 32, 32>}, {pipeline_mode = #tpu.pipeline_mode<synchronous>, transform_indices = @transform_4, window_bounds = array<i64: 32, 32>}, {pipeline_mode = #tpu.pipeline_mode<synchronous>, transform_indices = @transform_5, window_bounds = array<i64: 1, 32>}, {pipeline_mode = #tpu.pipeline_mode<synchronous>, transform_indices = @transform_6, window_bounds = array<i64: 32, 1>}, {pipeline_mode = #tpu.pipeline_mode<synchronous>, transform_indices = @transform_7, window_bounds = array<i64: 1, 1>}, {transform_indices = @transform_8, window_bounds = array<i64: 1, 8, 1>}]} {
    %c0 = arith.constant 0 : index
    %c0_0 = arith.constant 0 : index
    %c0_1 = arith.constant 0 : index
    %0 = vector.load %arg1[%c0, %c0_0, %c0_1] : memref<8x24x32xbf16, #tpu.memory_space<vmem>>, vector<8x24x32xbf16>
    %cst = arith.constant 0.000000e+00 : f32
    %1 = vector.broadcast %cst : f32 to vector<128x64xf32>
    %2 = vector.extract_strided_slice %0 {offsets = [0, 0, 0], sizes = [8, 16, 32], strides = [1, 1, 1]} : vector<8x24x32xbf16> to vector<8x16x32xbf16>
    %3 = vector.shape_cast %2 : vector<8x16x32xbf16> to vector<128x32xbf16>
    %c0_2 = arith.constant 0 : index
    %c0_3 = arith.constant 0 : index
    %c0_4 = arith.constant 0 : index
    %4 = vector.load %arg2[%c0_2, %c0_3, %c0_4] : memref<9x32x64xbf16, #tpu.memory_space<vmem>>, vector<1x32x64xbf16>
    %5 = vector.shape_cast %4 : vector<1x32x64xbf16> to vector<32x64xbf16>
    %cst_5 = arith.constant dense<0.000000e+00> : vector<128x64xf32>
    %6 = tpu.matmul %3, %5, %cst_5 {dimension_numbers = #tpu.dot_dimension_numbers<[1], [0], [0], [1], [0, 0, 1, 1], [], []>} : vector<128x32xbf16>, vector<32x64xbf16>, vector<128x64xf32> -> vector<128x64xf32>
    %7 = arith.addf %1, %6 : vector<128x64xf32>
    %8 = vector.extract_strided_slice %0 {offsets = [0, 1, 0], sizes = [8, 16, 32], strides = [1, 1, 1]} : vector<8x24x32xbf16> to vector<8x16x32xbf16>
    %9 = vector.shape_cast %8 : vector<8x16x32xbf16> to vector<128x32xbf16>
    %c1 = arith.constant 1 : index
    %c0_6 = arith.constant 0 : index
    %c0_7 = arith.constant 0 : index
    %10 = vector.load %arg2[%c1, %c0_6, %c0_7] : memref<9x32x64xbf16, #tpu.memory_space<vmem>>, vector<1x32x64xbf16>
    %11 = vector.shape_cast %10 : vector<1x32x64xbf16> to vector<32x64xbf16>
    %cst_8 = arith.constant dense<0.000000e+00> : vector<128x64xf32>
    %12 = tpu.matmul %9, %11, %cst_8 {dimension_numbers = #tpu.dot_dimension_numbers<[1], [0], [0], [1], [0, 0, 1, 1], [], []>} : vector<128x32xbf16>, vector<32x64xbf16>, vector<128x64xf32> -> vector<128x64xf32>
    %13 = arith.addf %7, %12 : vector<128x64xf32>
    %14 = vector.extract_strided_slice %0 {offsets = [0, 2, 0], sizes = [8, 16, 32], strides = [1, 1, 1]} : vector<8x24x32xbf16> to vector<8x16x32xbf16>
    %15 = vector.shape_cast %14 : vector<8x16x32xbf16> to vector<128x32xbf16>
    %c2 = arith.constant 2 : index
    %c0_9 = arith.constant 0 : index
    %c0_10 = arith.constant 0 : index
    %16 = vector.load %arg2[%c2, %c0_9, %c0_10] : memref<9x32x64xbf16, #tpu.memory_space<vmem>>, vector<1x32x64xbf16>
    %17 = vector.shape_cast %16 : vector<1x32x64xbf16> to vector<32x64xbf16>
    %cst_11 = arith.constant dense<0.000000e+00> : vector<128x64xf32>
    %18 = tpu.matmul %15, %17, %cst_11 {dimension_numbers = #tpu.dot_dimension_numbers<[1], [0], [0], [1], [0, 0, 1, 1], [], []>} : vector<128x32xbf16>, vector<32x64xbf16>, vector<128x64xf32> -> vector<128x64xf32>
    %19 = arith.addf %13, %18 : vector<128x64xf32>
    %20 = vector.extract_strided_slice %0 {offsets = [0, 3, 0], sizes = [8, 16, 32], strides = [1, 1, 1]} : vector<8x24x32xbf16> to vector<8x16x32xbf16>
    %21 = vector.shape_cast %20 : vector<8x16x32xbf16> to vector<128x32xbf16>
    %c3 = arith.constant 3 : index
    %c0_12 = arith.constant 0 : index
    %c0_13 = arith.constant 0 : index
    %22 = vector.load %arg2[%c3, %c0_12, %c0_13] : memref<9x32x64xbf16, #tpu.memory_space<vmem>>, vector<1x32x64xbf16>
    %23 = vector.shape_cast %22 : vector<1x32x64xbf16> to vector<32x64xbf16>
    %cst_14 = arith.constant dense<0.000000e+00> : vector<128x64xf32>
    %24 = tpu.matmul %21, %23, %cst_14 {dimension_numbers = #tpu.dot_dimension_numbers<[1], [0], [0], [1], [0, 0, 1, 1], [], []>} : vector<128x32xbf16>, vector<32x64xbf16>, vector<128x64xf32> -> vector<128x64xf32>
    %25 = arith.addf %19, %24 : vector<128x64xf32>
    %26 = vector.extract_strided_slice %0 {offsets = [0, 4, 0], sizes = [8, 16, 32], strides = [1, 1, 1]} : vector<8x24x32xbf16> to vector<8x16x32xbf16>
    %27 = vector.shape_cast %26 : vector<8x16x32xbf16> to vector<128x32xbf16>
    %c4 = arith.constant 4 : index
    %c0_15 = arith.constant 0 : index
    %c0_16 = arith.constant 0 : index
    %28 = vector.load %arg2[%c4, %c0_15, %c0_16] : memref<9x32x64xbf16, #tpu.memory_space<vmem>>, vector<1x32x64xbf16>
    %29 = vector.shape_cast %28 : vector<1x32x64xbf16> to vector<32x64xbf16>
    %cst_17 = arith.constant dense<0.000000e+00> : vector<128x64xf32>
    %30 = tpu.matmul %27, %29, %cst_17 {dimension_numbers = #tpu.dot_dimension_numbers<[1], [0], [0], [1], [0, 0, 1, 1], [], []>} : vector<128x32xbf16>, vector<32x64xbf16>, vector<128x64xf32> -> vector<128x64xf32>
    %31 = arith.addf %25, %30 : vector<128x64xf32>
    %32 = vector.extract_strided_slice %0 {offsets = [0, 5, 0], sizes = [8, 16, 32], strides = [1, 1, 1]} : vector<8x24x32xbf16> to vector<8x16x32xbf16>
    %33 = vector.shape_cast %32 : vector<8x16x32xbf16> to vector<128x32xbf16>
    %c5 = arith.constant 5 : index
    %c0_18 = arith.constant 0 : index
    %c0_19 = arith.constant 0 : index
    %34 = vector.load %arg2[%c5, %c0_18, %c0_19] : memref<9x32x64xbf16, #tpu.memory_space<vmem>>, vector<1x32x64xbf16>
    %35 = vector.shape_cast %34 : vector<1x32x64xbf16> to vector<32x64xbf16>
    %cst_20 = arith.constant dense<0.000000e+00> : vector<128x64xf32>
    %36 = tpu.matmul %33, %35, %cst_20 {dimension_numbers = #tpu.dot_dimension_numbers<[1], [0], [0], [1], [0, 0, 1, 1], [], []>} : vector<128x32xbf16>, vector<32x64xbf16>, vector<128x64xf32> -> vector<128x64xf32>
    %37 = arith.addf %31, %36 : vector<128x64xf32>
    %38 = vector.extract_strided_slice %0 {offsets = [0, 6, 0], sizes = [8, 16, 32], strides = [1, 1, 1]} : vector<8x24x32xbf16> to vector<8x16x32xbf16>
    %39 = vector.shape_cast %38 : vector<8x16x32xbf16> to vector<128x32xbf16>
    %c6 = arith.constant 6 : index
    %c0_21 = arith.constant 0 : index
    %c0_22 = arith.constant 0 : index
    %40 = vector.load %arg2[%c6, %c0_21, %c0_22] : memref<9x32x64xbf16, #tpu.memory_space<vmem>>, vector<1x32x64xbf16>
    %41 = vector.shape_cast %40 : vector<1x32x64xbf16> to vector<32x64xbf16>
    %cst_23 = arith.constant dense<0.000000e+00> : vector<128x64xf32>
    %42 = tpu.matmul %39, %41, %cst_23 {dimension_numbers = #tpu.dot_dimension_numbers<[1], [0], [0], [1], [0, 0, 1, 1], [], []>} : vector<128x32xbf16>, vector<32x64xbf16>, vector<128x64xf32> -> vector<128x64xf32>
    %43 = arith.addf %37, %42 : vector<128x64xf32>
    %44 = vector.extract_strided_slice %0 {offsets = [0, 7, 0], sizes = [8, 16, 32], strides = [1, 1, 1]} : vector<8x24x32xbf16> to vector<8x16x32xbf16>
    %45 = vector.shape_cast %44 : vector<8x16x32xbf16> to vector<128x32xbf16>
    %c7 = arith.constant 7 : index
    %c0_24 = arith.constant 0 : index
    %c0_25 = arith.constant 0 : index
    %46 = vector.load %arg2[%c7, %c0_24, %c0_25] : memref<9x32x64xbf16, #tpu.memory_space<vmem>>, vector<1x32x64xbf16>
    %47 = vector.shape_cast %46 : vector<1x32x64xbf16> to vector<32x64xbf16>
    %cst_26 = arith.constant dense<0.000000e+00> : vector<128x64xf32>
    %48 = tpu.matmul %45, %47, %cst_26 {dimension_numbers = #tpu.dot_dimension_numbers<[1], [0], [0], [1], [0, 0, 1, 1], [], []>} : vector<128x32xbf16>, vector<32x64xbf16>, vector<128x64xf32> -> vector<128x64xf32>
    %49 = arith.addf %43, %48 : vector<128x64xf32>
    %50 = vector.extract_strided_slice %0 {offsets = [0, 8, 0], sizes = [8, 16, 32], strides = [1, 1, 1]} : vector<8x24x32xbf16> to vector<8x16x32xbf16>
    %51 = vector.shape_cast %50 : vector<8x16x32xbf16> to vector<128x32xbf16>
    %c8 = arith.constant 8 : index
    %c0_27 = arith.constant 0 : index
    %c0_28 = arith.constant 0 : index
    %52 = vector.load %arg2[%c8, %c0_27, %c0_28] : memref<9x32x64xbf16, #tpu.memory_space<vmem>>, vector<1x32x64xbf16>
    %53 = vector.shape_cast %52 : vector<1x32x64xbf16> to vector<32x64xbf16>
    %cst_29 = arith.constant dense<0.000000e+00> : vector<128x64xf32>
    %54 = tpu.matmul %51, %53, %cst_29 {dimension_numbers = #tpu.dot_dimension_numbers<[1], [0], [0], [1], [0, 0, 1, 1], [], []>} : vector<128x32xbf16>, vector<32x64xbf16>, vector<128x64xf32> -> vector<128x64xf32>
    %55 = arith.addf %49, %54 : vector<128x64xf32>
    %c0_30 = arith.constant 0 : index
    %c0_31 = arith.constant 0 : index
    %56 = vector.load %arg3[%c0_30, %c0_31] : memref<1x64xf32, #tpu.memory_space<vmem>>, vector<1x64xf32>
    %57 = vector.broadcast %56 : vector<1x64xf32> to vector<128x64xf32>
    %58 = arith.addf %55, %57 : vector<128x64xf32>
    %59 = vector.shape_cast %58 : vector<128x64xf32> to vector<8x16x64xf32>
    %60 = vector.extract_strided_slice %59 {offsets = [0, 0, 0], sizes = [8, 16, 32], strides = [1, 1, 1]} : vector<8x16x64xf32> to vector<8x16x32xf32>
    %61 = vector.extract_strided_slice %59 {offsets = [0, 0, 32], sizes = [8, 16, 32], strides = [1, 1, 1]} : vector<8x16x64xf32> to vector<8x16x32xf32>
    %cst_32 = arith.constant dense<0xFF800000> : vector<8x32xf32>
    %62 = vector.multi_reduction <maximumf>, %61, %cst_32 [1] : vector<8x16x32xf32> to vector<8x32xf32>
    %63 = vector.shape_cast %62 : vector<8x32xf32> to vector<8x1x32xf32>
    %64 = vector.broadcast %63 : vector<8x1x32xf32> to vector<8x16x32xf32>
    %65 = arith.subf %61, %64 : vector<8x16x32xf32>
    %66 = math.exp %65 : vector<8x16x32xf32>
    %cst_33 = arith.constant dense<0.000000e+00> : vector<8x32xf32>
    %67 = vector.multi_reduction <add>, %66, %cst_33 [1] : vector<8x16x32xf32> to vector<8x32xf32>
    %68 = vector.shape_cast %67 : vector<8x32xf32> to vector<8x1x32xf32>
    %69 = tpu.reciprocal %68 {approx = true} : vector<8x1x32xf32> -> vector<8x1x32xf32>
    %70 = vector.broadcast %69 : vector<8x1x32xf32> to vector<8x16x32xf32>
    %71 = arith.mulf %66, %70 : vector<8x16x32xf32>
    %72 = arith.mulf %60, %71 : vector<8x16x32xf32>
    %cst_34 = arith.constant dense<0.000000e+00> : vector<8x32xf32>
    %73 = vector.multi_reduction <add>, %72, %cst_34 [1] : vector<8x16x32xf32> to vector<8x32xf32>
    %cst_35 = arith.constant dense<0xFF800000> : vector<8x32xf32>
    %74 = vector.multi_reduction <maximumf>, %60, %cst_35 [1] : vector<8x16x32xf32> to vector<8x32xf32>
    %c0_36 = arith.constant 0 : index
    %c0_37 = arith.constant 0 : index
    %75 = vector.load %arg4[%c0_36, %c0_37] : memref<32x32xf32, #tpu.memory_space<vmem>>, vector<32x32xf32>
    %cst_38 = arith.constant dense<0.000000e+00> : vector<8x32xf32>
    %76 = tpu.matmul %73, %75, %cst_38 {dimension_numbers = #tpu.dot_dimension_numbers<[1], [0], [0], [1], [0, 0, 1, 1], [], []>} : vector<8x32xf32>, vector<32x32xf32>, vector<8x32xf32> -> vector<8x32xf32>
    %c0_39 = arith.constant 0 : index
    %c0_40 = arith.constant 0 : index
    %77 = vector.load %arg5[%c0_39, %c0_40] : memref<32x32xf32, #tpu.memory_space<vmem>>, vector<32x32xf32>
    %cst_41 = arith.constant dense<0.000000e+00> : vector<8x32xf32>
    %78 = tpu.matmul %74, %77, %cst_41 {dimension_numbers = #tpu.dot_dimension_numbers<[1], [0], [0], [1], [0, 0, 1, 1], [], []>} : vector<8x32xf32>, vector<32x32xf32>, vector<8x32xf32> -> vector<8x32xf32>
    %79 = arith.addf %76, %78 : vector<8x32xf32>
    %c0_42 = arith.constant 0 : index
    %c0_43 = arith.constant 0 : index
    %80 = vector.load %arg6[%c0_42, %c0_43] : memref<1x32xf32, #tpu.memory_space<vmem>>, vector<1x32xf32>
    %81 = vector.broadcast %80 : vector<1x32xf32> to vector<8x32xf32>
    %82 = arith.addf %79, %81 : vector<8x32xf32>
    %cst_44 = arith.constant 0.000000e+00 : f32
    %83 = vector.broadcast %cst_44 : f32 to vector<8x32xf32>
    %84 = arith.maximumf %82, %83 : vector<8x32xf32>
    %c0_45 = arith.constant 0 : index
    %c0_46 = arith.constant 0 : index
    %85 = vector.load %arg7[%c0_45, %c0_46] : memref<32x1xf32, #tpu.memory_space<vmem>>, vector<32x1xf32>
    %cst_47 = arith.constant dense<0.000000e+00> : vector<8x1xf32>
    %86 = tpu.matmul %84, %85, %cst_47 {dimension_numbers = #tpu.dot_dimension_numbers<[1], [0], [0], [1], [0, 0, 1, 1], [], []>} : vector<8x32xf32>, vector<32x1xf32>, vector<8x1xf32> -> vector<8x1xf32>
    %c0_48 = arith.constant 0 : index
    %c0_49 = arith.constant 0 : index
    %87 = vector.load %arg8[%c0_48, %c0_49] : memref<1x1xf32, #tpu.memory_space<vmem>>, vector<1x1xf32>
    %88 = vector.broadcast %87 : vector<1x1xf32> to vector<8x1xf32>
    %89 = arith.addf %86, %88 : vector<8x1xf32>
    %c0_50 = arith.constant 0 : index
    %c0_51 = arith.constant 0 : index
    %c0_52 = arith.constant 0 : index
    %90 = vector.load %arg9[%c0_50, %c0_51, %c0_52] : memref<1x8x1xf32, #tpu.memory_space<vmem>>, vector<1x8x1xf32>
    %91 = vector.shape_cast %90 : vector<1x8x1xf32> to vector<8x1xf32>
    %92 = vector.shape_cast %89 : vector<8x1xf32> to vector<1x8x1xf32>
    tpu.vector_store %arg9[%c0_50, %c0_51, %c0_52], %92 {strides = array<i32>} : memref<1x8x1xf32, #tpu.memory_space<vmem>>, vector<1x8x1xf32>,
    return
  }
  func.func @transform_0(%arg0: i32) -> (i32, i32, i32) {
    %c0_i32 = arith.constant 0 : i32
    %c0_i32_0 = arith.constant 0 : i32
    %c0_i32_1 = arith.constant 0 : i32
    return %arg0, %c0_i32, %c0_i32_0 : i32, i32, i32
  }
  func.func @transform_1(%arg0: i32) -> (i32, i32, i32) {
    %c0_i32 = arith.constant 0 : i32
    %c0_i32_0 = arith.constant 0 : i32
    %c0_i32_1 = arith.constant 0 : i32
    %c0_i32_2 = arith.constant 0 : i32
    return %c0_i32, %c0_i32_0, %c0_i32_1 : i32, i32, i32
  }
  func.func @transform_2(%arg0: i32) -> (i32, i32) {
    %c0_i32 = arith.constant 0 : i32
    %c0_i32_0 = arith.constant 0 : i32
    %c0_i32_1 = arith.constant 0 : i32
    return %c0_i32, %c0_i32_0 : i32, i32
  }
  func.func @transform_3(%arg0: i32) -> (i32, i32) {
    %c0_i32 = arith.constant 0 : i32
    %c0_i32_0 = arith.constant 0 : i32
    %c0_i32_1 = arith.constant 0 : i32
    return %c0_i32, %c0_i32_0 : i32, i32
  }
  func.func @transform_4(%arg0: i32) -> (i32, i32) {
    %c0_i32 = arith.constant 0 : i32
    %c0_i32_0 = arith.constant 0 : i32
    %c0_i32_1 = arith.constant 0 : i32
    return %c0_i32, %c0_i32_0 : i32, i32
  }
  func.func @transform_5(%arg0: i32) -> (i32, i32) {
    %c0_i32 = arith.constant 0 : i32
    %c0_i32_0 = arith.constant 0 : i32
    %c0_i32_1 = arith.constant 0 : i32
    return %c0_i32, %c0_i32_0 : i32, i32
  }
  func.func @transform_6(%arg0: i32) -> (i32, i32) {
    %c0_i32 = arith.constant 0 : i32
    %c0_i32_0 = arith.constant 0 : i32
    %c0_i32_1 = arith.constant 0 : i32
    return %c0_i32, %c0_i32_0 : i32, i32
  }
  func.func @transform_7(%arg0: i32) -> (i32, i32) {
    %c0_i32 = arith.constant 0 : i32
    %c0_i32_0 = arith.constant 0 : i32
    %c0_i32_1 = arith.constant 0 : i32
    return %c0_i32, %c0_i32_0 : i32, i32
  }
  func.func @transform_8(%arg0: i32) -> (i32, i32, i32) {
    %c0_i32 = arith.constant 0 : i32
    %c0_i32_0 = arith.constant 0 : i32
    %c0_i32_1 = arith.constant 0 : i32
    return %arg0, %c0_i32, %c0_i32_0 : i32, i32, i32
  }
}

</mosaic_0001>

<bundles_post_ra>
// kernel: tpu_custom_call.1
= control target key start
LH: loop header
LB: loop body
LE: loop exit
PB: predicated region body
PF: predicated region fallthrough
CT: control target
= control target key end

     0   :  { %s5919_s0 = inlined_call_operand.hbm [shape: bf16[16,24,32], index: 0, kind: input, shape index: {}]   ;;  %s5920_s1 = inlined_call_operand.hbm [shape: bf16[9,32,64], index: 1, kind: input, shape index: {}]   ;;  %s5921_s2 = inlined_call_operand.vmem [shape: f32[1,64], index: 2, kind: input, shape index: {}]   ;;  %s5922_s3 = inlined_call_operand.vmem [shape: f32[32,32], index: 3, kind: input, shape index: {}]   ;;  %s5923_s4 = inlined_call_operand.hbm [shape: f32[32,32], index: 4, kind: input, shape index: {}]   ;;  %s5924_s5 = inlined_call_operand.vmem [shape: f32[1,32], index: 5, kind: input, shape index: {}]   ;;  %s5925_s6 = inlined_call_operand.vmem [shape: f32[32,1], index: 6, kind: input, shape index: {}]   ;;  %s5926_s7 = inlined_call_operand.<no memory space> [shape: f32[1,1], index: 7, kind: input, shape index: {}]   ;;  %s5927_s8 = inlined_call_operand.vmem [shape: f32[2,8,1], index: 8, kind: output, shape index: {}]  }
   0x1   :  { %v13_v0 = vstv %s5926_s7 }
   0x2   :  { %14 = vst [vmem:[#allocation2] sm:$0x1] %v13_v0 }
   0x3   :  { %15 = vsyncpa [#allocation4], 0 }
   0x4   :  { %17 = vsyncpa [#allocation4 + $0x1], 0 }
   0x5   :  { %18 = vsyncpa [#allocation6], 0  ;;  %s4509_s29 = smov 0   ;;  %s4511_s30 = smov 0  }
   0x6   :  { %s4513_s9 = smov 0   ;;  %s4515_s10 = smov 0  }
   0x7 LB: > { %s4528_s7 = sadd.s32 4294967295, %s4448_s10   ;;  %p44_p0 = scmp.ne.s32.totalorder %s4440_s30, %s4436_s29  ;;  %s4448_s10 = sphi %s4515_s10, %s6148_s10   ;;  %s4444_s9 = sphi %s4513_s9, %s6151_s9   ;;  %s4440_s30 = sphi %s4511_s30, %s6150_s30   ;;  %s4436_s29 = sphi %s4509_s29, %s6149_s29  }
   0x8   : > { %p5928_p1 = scmp.eq.s32.totalorder %s4528_s7, 0  ;;  %p3478_p2 = scmp.ge.s32.totalorder %s4448_s10, 1 }
   0x9   : > { %p228_p3 = scmp.lt.s32.totalorder %s4448_s10, 3  ;;  %s4450_s13 = smov [#allocation5]  }
   0xa   : > { %p4536_p4 = por %p5928_p1, %p44_p0  ;;  %s240_s14 = sshll.u32 %s4450_s13, 4  ;;  %s241_s14 = int_to_ptr.vmem [resolvable:$true] %s240_s14 }
   0xb   : > { %p4540_p5 = pnand %p3478_p2, %p228_p3  ;;  %s4451_s16 = smov [#allocation7]  }
   0xc   : > { %s6018_s11 = scalar_select %p4536_p4, 1, 0 }
   0xd   : > { %s6019_s12 = scalar_select %p4540_p5, 1, 0 }
   0xe   : > { %p4168_p6 = pneg %p4540_p5  ;;  %s259_s17 = sshll.u32 %s4451_s16, 4  ;;  %s4552_s17 = int_to_ptr.vmem [resolvable:$true] %s259_s17 }
   0xf   : > { %s4324_s20 = scalar_lea.hbm %s5920_s1, 2304 }
  0x10   : > { %p4548_p7 = pnand %p4168_p6, %p5928_p1  ;;  %p4325_p8 = scmp.ne.s32.totalorder %s5920_s1, %s4324_s20 }
  0x11   : > { %p4331_p12 = scmp.lt.u32.totalorder %s4324_s20, %s5920_s1 }
  0x12   : > { %p4326_p9 = pneg %p4548_p7 }
  0x14   : > { %p4327_p10 = pnand %p4326_p9, %p4325_p8 }
  0x16   : > { %p4328_p11 = pneg %p4327_p10 }
  0x18   : > { %p4333_p13 = pnand %p4331_p12, %p4328_p11 }
  0x1a   : > { %4336 = shalt.err (!%p4333_p13)
}
  0x1b   : > { %s4337_s25 = scalar_lea.vmem %s241_s14, 2304  ;;  %p4345_p6 = scmp.lt.s32.totalorder %s241_s14, %s241_s14 }
  0x1c   : > { %p4338_p0 = scmp.ne.s32.totalorder %s241_s14, %s4337_s25  ;;  %p4346_p1 = scmp.lt.s32.totalorder %s4337_s25, %s4337_s25 }
  0x1e   : > { %p4340_p2 = pnand %p4338_p0, %p4326_p9  ;;  %p4347_p4 = por %p4346_p1, %p4345_p6 }
  0x20   : > { %p4341_p3 = pneg %p4340_p2 }
  0x22   : > { %p4348_p5 = pnand %p4347_p4, %p4341_p3 }
  0x24   : > { %4351 = shalt.err (!%p4348_p5)
}
  0x25   : > { %s4452_s26 = smov 64   ;;  %s4453_s27 = smov 4  }
  0x26   : > { %4171 = dma.hbm_to_vmem [thread:$0]  (!%p4548_p7), %s5920_s1, 2304, %s241_s14, [#allocation6], %s4452_s26, %s4452_s26, %s4453_s27  }
  0x27   : > { %s4352_s18 = scalar_lea.hbm %s5923_s4, 512 }
  0x28   : > { %p4353_p1 = scmp.ne.s32.totalorder %s5923_s4, %s4352_s18  ;;  %p4359_p8 = scmp.lt.u32.totalorder %s4352_s18, %s5923_s4 }
  0x2a   : > { %p4355_p4 = pnand %p4353_p1, %p4326_p9 }
  0x2c   : > { %p4356_p5 = pneg %p4355_p4 }
  0x2e   : > { %p4361_p10 = pnand %p4359_p8, %p4356_p5 }
  0x30   : > { %4364 = shalt.err (!%p4361_p10)
}
  0x31   : > { %s4365_s14 = scalar_lea.vmem %s4552_s17, 512  ;;  %p4373_p0 = scmp.lt.s32.totalorder %s4552_s17, %s4552_s17 }
  0x32   : > { %p4366_p11 = scmp.ne.s32.totalorder %s4552_s17, %s4365_s14  ;;  %p4374_p2 = scmp.lt.s32.totalorder %s4365_s14, %s4365_s14 }
  0x34   : > { %p4368_p12 = pnand %p4366_p11, %p4326_p9  ;;  %p4375_p3 = por %p4374_p2, %p4373_p0 }
  0x36   : > { %p4369_p13 = pneg %p4368_p12 }
  0x38   : > { %p4376_p6 = pnand %p4375_p3, %p4369_p13 }
  0x3a   : > { %4379 = shalt.err (!%p4376_p6)
}
  0x3b   : > { %s4454_s23 = smov 128   ;;  %s4455_s24 = smov 8  }
  0x3c   : > { %4174 = dma.hbm_to_vmem [thread:$0]  (!%p4548_p7), %s5923_s4, 512, %s4552_s17, [#allocation6], %s4454_s23, %s4454_s23, %s4455_s24  }
  0x3d   : > { %s4605_s29 = sadd.s32 1, %s4448_s10   ;;  %s31_s16 = sadd.s32 1, %s4444_s9 }
  0x3e   : > { %s28_s13 = ssub.s32 %s4448_s10, %s4605_s29  ;;  %p38_p1 = scmp.ne.s32.totalorder %s4444_s9, %s4440_s30 }
  0x3f   : > { %p29_p9 = scmp.eq.s32.totalorder %s28_s13, 0  ;;  %p39_p4 = scmp.eq.s32.totalorder %s4448_s10, 0 }
  0x40   : > { %p4181_p8 = scmp.lt.s32.totalorder %s4448_s10, 2  ;;  %s282_s19 = sand.u32 1, %s4444_s9  }
  0x41   : > { %s4614_s18 = scalar_select %p29_p9, %s4444_s9, %s31_s16  }
  0x42   : > { %p40_p5 = por %p39_p4, %p38_p1  ;;  %s4156_s20 = smul.u32 1536, %s4448_s10 }
  0x43   : > { %s4155_s21 = smul.u32 96, %s282_s19  ;;  %s4630_s10 = scalar_lea.sflag [#allocation4], %s282_s19 }
  0x44   : > { %p4619_p10 = pnand %p4181_p8, %p40_p5  ;;  %s4626_s14 = scalar_lea.hbm %s5919_s0, %s4156_s20 }
  0x45   : > { %s286_s23 = scalar_lea.vmem [#allocation3], %s4155_s21  ;;  %s4380_s25 = scalar_lea.hbm %s4626_s14, 1536 }
  0x46   : > { %s294_s24 = sshll.u32 %s286_s23, 4  ;;  %p4381_p7 = scmp.ne.s32.totalorder %s4626_s14, %s4380_s25  ;;  %s4628_s24 = int_to_ptr.vmem [resolvable:$true] %s294_s24 }
  0x47   : > { %p4382_p11 = pneg %p4619_p10  ;;  %s4385_s16 = scalar_lea.hbm %s5919_s0, 3072 }
  0x48   : > { %p4386_p0 = scmp.lt.u32.totalorder %s4626_s14, %s5919_s0  ;;  %p4387_p2 = scmp.lt.u32.totalorder %s4385_s16, %s4380_s25 }
  0x49   : > { %p4383_p12 = pnand %p4382_p11, %p4381_p7  ;;  %p4389_p6 = scmp.lt.u32.totalorder %s4380_s25, %s4626_s14 }
  0x4a   : > { %p4388_p3 = por %p4387_p2, %p4386_p0 }
  0x4b   : > { %p4384_p13 = pneg %p4383_p12 }
  0x4c   : > { %p4390_p9 = por %p4389_p6, %p4388_p3 }
  0x4e   : > { %p4391_p1 = pnand %p4390_p9, %p4384_p13 }
  0x50   : > { %4394 = shalt.err (!%p4391_p1)
}
  0x51   : > { %s4395_s19 = scalar_lea.vmem %s4628_s24, 1536  ;;  %s4456_s21 = smov [#allocation3]  }
  0x52   : > { %p4396_p4 = scmp.ne.s32.totalorder %s4628_s24, %s4395_s19  ;;  %s4400_s22 = sshll.u32 %s4456_s21, 4  ;;  %s4401_s22 = int_to_ptr.vmem [resolvable:$false] %s4400_s22 }
  0x53   : > { %s4402_s23 = scalar_lea.vmem %s4401_s22, 3072  ;;  %p4403_p7 = scmp.lt.s32.totalorder %s4628_s24, %s4401_s22 }
  0x54   : > { %p4398_p5 = pnand %p4396_p4, %p4382_p11  ;;  %p4404_p12 = scmp.lt.s32.totalorder %s4402_s23, %s4395_s19 }
  0x56   : > { %p4399_p8 = pneg %p4398_p5  ;;  %p4405_p0 = por %p4404_p12, %p4403_p7 }
  0x58   : > { %p4406_p2 = pnand %p4405_p0, %p4399_p8 }
  0x5a   : > { %4409 = shalt.err (!%p4406_p2)
}
  0x5b   : > { %4178 = dma.hbm_to_vmem [thread:$0]  (!%p4619_p10), %s4626_s14, 1536, %s4628_s24, %s4630_s10, %s4452_s26, %s4452_s26, %s4453_s27  }
  0x5c   : > { %p6022_p11 = scmp.ne.s32.totalorder %s6019_s12, 0 }
  0x5e   : > { %306 = sbr.rel (%p6022_p11) target bundleno = 1179 (0x49b), region = 52 }
  0x65   : > { %s308_s25 = sand.u32 1, %s4440_s30   ;;  %p6023_p13 = scmp.ne.s32.totalorder %s6018_s11, 0 }
  0x66   : > { %s4157_s28 = smul.u32 96, %s308_s25  ;;  %s309_s13 = scalar_lea.sflag [#allocation4], %s308_s25 }
  0x68   : > { %s4664_s16 = scalar_lea.vmem [#allocation3], %s4157_s28 }
  0x69   : > { %4427 = dma.done.wait (%p6023_p13), %s309_s13, 1536  }
  0x6a   : > { %4429 = vsyncadd (%p6023_p13), %s309_s13, 4294965760  ;;  %p6024_p3 = scmp.eq.s32.totalorder %s4528_s7, 0 }
  0x6c   : > { %4431 = dma.done.wait (%p6024_p3), [#allocation6], 2816   ;;  %p6025_p10 = pmov %p6024_p3 }
  0x6d   : > { %vm1463_vm0 = vcmask 1041408   ;;  %vm1464_vm1 = vcmask 1045508   ;;  %v4226_v2 = vld [vmem:[#allocation5 + $0x40] sm:$0xff]   ;;  %v4227_v3 = vld [vmem:[#allocation5 + $0x10] sm:$0xff]   ;;  %v4228_v4 = vld [vmem:[#allocation5 + $0x48] sm:$0xff]   ;;  %vm622_vm5 = vcmask 261120  }
  0x6e   : > { %4433 = vsyncadd (%p6025_p10), [#allocation6], 4294964480  ;;  %3876 = vmatprep.subr.bf16.mxu0 %v4226_v2  ;;  %vm386_vm3 = vsmask.f32 3328  ;;  %vm387_vm4 = vsmask.f32 7440  ;;  %3796 = vmatprep.subr.bf16.mxu1 %v4227_v3 }
  0x6f   : > { %vm4674_vm2 = vmor %vm1463_vm0, %vm1464_vm1  ;;  %3877 = vmatpush3.bf16.msra.mxu0 %v4226_v2  ;;  %v4229_v5 = vld [vmem:[#allocation5 + $0x18] sm:$0xff]   ;;  %3797 = vmatpush3.bf16.msra.mxu1 %v4227_v3  ;;  %v4679_v6 = vld [vmem:[%s4664_s16] sm:$0xf]  ;;  %vm1700_vm7 = vsmask.f32 1280  ;;  %vm1985_vm10 = vcmask 1040384  }
  0x70   : > { %3878 = vmatprep.subr.bf16.mxu0 %v4228_v4  ;;  %v4682_v7 = vld [vmem:[%s4664_s16 + $0x4] sm:$0xf]  ;;  %v4685_v8 = vld [vmem:[%s4664_s16 + $0x8] sm:$0xf]  ;;  %3798 = vmatprep.subr.bf16.mxu1 %v4229_v5  ;;  %v3569_v9 = vrot.slane %v4679_v6, 10  ;;  %v4230_v13 = vld [vmem:[#allocation5 + $0x50] sm:$0xff]  }
  0x71   : > { %6028 = vst [vmem:[#allocation10_spill] sm:$0xff] %v4685_v8  ;;  %v1468_v10 = vrot.slane %v4682_v7, 6  ;;  %v1471_v11 = vrot.slane %v4685_v8, 6  ;;  %v4691_v12 = vld [vmem:[%s4664_s16 + $0xc] sm:$0xf]  ;;  %v4701_v17 = vshrl.u32 %v4679_v6, 16  ;;  %vm4747_vm6 = vmor %vm386_vm3, %vm387_vm4 }
  0x72   : > { %v4694_v14 = vld [vmem:[%s4664_s16 + $0x10] sm:$0xf]  ;;  %v4697_v15 = vld [vmem:[%s4664_s16 + $0x14] sm:$0xf]  ;;  %v3570_v16 = vrot.slane %v4691_v12, 10  ;;  %v4711_v24 = vshll.u32 %v4679_v6, 16 }
  0x73   : > { %3879 = vmatpush3.bf16.msra.mxu0 %v4228_v4  ;;  %v1469_v19 = vsel %vm4674_vm2, %v3569_v9, %v1468_v10  ;;  %v1470_v20 = vrot.slane %v1468_v10, 4  ;;  %v1475_v21 = vrot.slane %v4694_v14, 6  ;;  %v1478_v22 = vrot.slane %v4697_v15, 6  ;;  %3799 = vmatpush3.bf16.msra.mxu1 %v4229_v5  ;;  %v4729_v35 = vld [vmem:[#allocation5] sm:$0xff]   ;;  %v4231_v44 = vld [vmem:[#allocation5 + $0x58] sm:$0xff]   ;;  %s4460_s26 = smov 96  }
  0x74   : > { %3896 = vmatprep.subr.bf16.mxu0 %v4230_v13  ;;  %v392_v23 = vrot.slane %v4701_v17, 4  ;;  %6029 = vst [vmem:[#allocation11_spill] sm:$0xff] %v4711_v24  ;;  %v4714_v25 = vshll.u32 %v4682_v7, 16  ;;  %v4717_v26 = vshrl.u32 %v4682_v7, 16  ;;  %v4724_v30 = vshll.u32 %v4685_v8, 16  ;;  %3816 = vmatprep.subr.bf16.mxu1 %v4729_v35  ;;  %v4786_v4 = vld [vmem:[#allocation5 + $0x60] sm:$0xff]  }
  0x75   : > { %v1472_v27 = vsel %vm4674_vm2, %v1470_v20, %v1471_v11  ;;  %v1476_v28 = vsel %vm4674_vm2, %v3570_v16, %v1475_v21  ;;  %v1477_v29 = vrot.slane %v1475_v21, 4  ;;  %v395_v32 = vrot.slane %v4711_v24, 5  ;;  %v4760_v50 = vld [vmem:[%s4664_s16 + $0x18] sm:$0xf]  ;;  %v4763_v51 = vld [vmem:[%s4664_s16 + $0x1c] sm:$0xf] }
  0x76   : > { %v3577_v31 = vcombine.low %v1469_v19, %v1472_v27  ;;  %v401_v33 = vrot.slane %v4714_v25, 5  ;;  %v405_v34 = vrot.slane %v4717_v26, 4  ;;  %v411_v37 = vrot.slane %v4724_v30, 5  ;;  %v4769_v56 = vld [vmem:[%s4664_s16 + $0x20] sm:$0xf]  ;;  %p353_p6 = scmp.lt.s32.totalorder %s4528_s7, 1 }
  0x77   : > { %v1479_v36 = vsel %vm4674_vm2, %v1477_v29, %v1478_v22  ;;  %v4735_v38 = vshrl.u32 %v4691_v12, 16  ;;  %v4738_v39 = vshll.u32 %v4691_v12, 16  ;;  %v396_v41 = vor.u32 %v395_v32, %v392_v23  ;;  %v4775_v61 = vld [vmem:[%s4664_s16 + $0x28] sm:$0xf]  ;;  %v4784_v3 = vld [vmem:[%s4664_s16 + $0x2c] sm:$0xf] }
  0x78   : > { %3880 = vmatprep.mubr.msk.bf16.mxu0 %vm622_vm5, %v3577_v31  ;;  %v3578_v40 = vcombine.low %v1476_v28, %v1479_v36  ;;  %v406_v42 = vor.u32 %v405_v34, %v401_v33  ;;  %v4742_v43 = vshll.u32 %v4694_v14, 16  ;;  %v4754_v48 = vshrl.u32 %v4694_v14, 16  ;;  %s6153_s7 = smov (!%p353_p6, %s4528_s7), 1 }
  0x79   : > { %v416_v46 = vrot.slane %v4735_v38, 4  ;;  %v419_v47 = vrot.slane %v4738_v39, 5  ;;  %v4757_v49 = vshll.u32 %v4697_v15, 16  ;;  %v397_v52 = vrot.slane %v396_v41, 4  ;;  %v4233_v41 = vld [vmem:[#allocation5 + $0x8] sm:$0xff]   ;;  %s3488_s27 = sshll.u32 %s6153_s7, 3 }
  0x7a   : > { %3881 = vmatmul.mubr.msk.bf16.vlgmr.msra.gmra.mrb[0].mxu0 %vm622_vm5, %v3578_v40  ;;  %v407_v53 = vrot.slane %v406_v42, 4  ;;  %v425_v54 = vrot.slane %v4742_v43, 5  ;;  %v429_v58 = vrot.slane %v4754_v48, 4  ;;  %v3571_v0 = vrot.slane %v4760_v50, 10  ;;  %s356_s24 = scalar_lea.vmem %s5927_s8, %s3488_s27 }
  0x7b   : > { %3897 = vmatpush3.bf16.msra.mxu0 %v4230_v13  ;;  %v420_v57 = vor.u32 %v419_v47, %v416_v46  ;;  %v435_v59 = vrot.slane %v4757_v49, 5  ;;  %v402_v62 = vsel %vm4747_vm6, %v397_v52, %v401_v33  ;;  %v1482_v2 = vrot.slane %v4763_v51, 6  ;;  %v4790_v13 = vld [vmem:[%s4664_s16 + $0x24] sm:$0xf]  ;;  %v4824_v52 = vld [vmem:[%s4664_s16 + $0x34] sm:$0xf] }
  0x7c   : > { %v412_v63 = vsel %vm4747_vm6, %v407_v53, %v411_v37  ;;  %3898 = vmatprep.subr.bf16.mxu0 %v4231_v44  ;;  %v430_v10 = vor.u32 %v429_v58, %v425_v54  ;;  %v1485_v11 = vrot.slane %v4769_v56, 6  ;;  %6032 = vst [vmem:[#allocation12_spill] sm:$0xff] %v4790_v13  ;;  %v3572_v20 = vrot.slane %v4790_v13, 10  ;;  %6035 = vst [vmem:[#allocation15_spill] sm:$0xff] %v4824_v52 }
  0x7d   : > { %v3489_v5 = vcombine.low %v402_v62, %v412_v63  ;;  %v421_v9 = vrot.slane %v420_v57, 4  ;;  %v1483_v16 = vsel %vm4674_vm2, %v3571_v0, %v1482_v2  ;;  %v1484_v19 = vrot.slane %v1482_v2, 4 }
  0x7e   : > { %v1489_v21 = vrot.slane %v4775_v61, 6  ;;  %v431_v23 = vrot.slane %v430_v10, 4  ;;  %v1492_v27 = vrot.slane %v4784_v3, 6  ;;  %v4801_v28 = vshrl.u32 %v4760_v50, 16 }
  0x7f   : > { %3800 = vmatprep.mubr.msk.bf16.mxu1 %vm622_vm5, %v3489_v5  ;;  %v426_v22 = vsel %vm4747_vm6, %v421_v9, %v425_v54  ;;  %3899 = vmatpush3.bf16.msra.mxu0 %v4231_v44  ;;  %v1486_v29 = vsel %vm4674_vm2, %v1484_v19, %v1485_v11  ;;  %v4808_v33 = vshll.u32 %v4760_v50, 16  ;;  %v4815_v40 = vshll.u32 %v4763_v51, 16  ;;  %v4846_v5 = vld [vmem:[%s4664_s16 + $0x30] sm:$0xf]  ;;  %v4858_v19 = vld [vmem:[%s4664_s16 + $0x40] sm:$0xf] }
  0x80   : > { %v1490_v31 = vsel %vm4674_vm2, %v3572_v20, %v1489_v21  ;;  %v1491_v32 = vrot.slane %v1489_v21, 4  ;;  %3916 = vmatprep.subr.bf16.mxu0 %v4786_v4  ;;  %v436_v34 = vsel %vm4747_vm6, %v431_v23, %v435_v59  ;;  %v3579_v36 = vcombine.low %v1483_v16, %v1486_v29  ;;  %v4835_v59 = vld [vmem:[%s4664_s16 + $0x38] sm:$0xf]  ;;  %6040 = vst [vmem:[#allocation20_spill] sm:$0xff] %v4846_v5  ;;  %v4861_v20 = vld [vmem:[%s4664_s16 + $0x44] sm:$0xf] }
  0x81   : > { %6033 = vst [vmem:[#allocation13_spill] sm:$0xff] %v4808_v33  ;;  %v440_v37 = vrot.slane %v4801_v28, 4  ;;  %6034 = vst [vmem:[#allocation14_spill] sm:$0xff] %v4815_v40  ;;  %v3490_v42 = vcombine.low %v426_v22, %v436_v34  ;;  %v443_v46 = vrot.slane %v4808_v33, 5  ;;  %v4821_v47 = vshrl.u32 %v4763_v51, 16 }
  0x82   : > { %v1493_v44 = vsel %vm4674_vm2, %v1491_v32, %v1492_v27  ;;  %3884 = vmatprep.mubr.msk.bf16.mxu0 %vm622_vm5, %v3579_v36  ;;  %v449_v54 = vrot.slane %v4815_v40, 5  ;;  %v4829_v57 = vshll.u32 %v4769_v56, 16  ;;  %v4832_v58 = vshrl.u32 %v4790_v13, 16  ;;  %6043 = vst [vmem:[#allocation23_spill] sm:$0xff] %v4858_v19  ;;  %6044 = vst [vmem:[#allocation24_spill] sm:$0xff] %v4861_v20 }
  0x83   : > { %v3580_v53 = vcombine.low %v1490_v31, %v1493_v44  ;;  %3801 = vmatmul.mubr.msk.bf16.vlgmr.msra.gmra.mrb[0].mxu1 %vm622_vm5, %v3490_v42  ;;  %v444_v62 = vor.u32 %v443_v46, %v440_v37  ;;  %v453_v63 = vrot.slane %v4821_v47, 4  ;;  %v4840_v0 = vshll.u32 %v4790_v13, 16  ;;  %v4867_v29 = vld [vmem:[%s4664_s16 + $0x3c] sm:$0xf]  ;;  %v4869_v31 = vld [vmem:[#allocation5 + $0x20] sm:$0xff]  }
  0x84   : > { %6036 = vst [vmem:[#allocation16_spill] sm:$0xff] %v4829_v57  ;;  %6037 = vst [vmem:[#allocation17_spill] sm:$0xff] %v4832_v58  ;;  %v4843_v2 = vshll.u32 %v4775_v61, 16  ;;  %v459_v9 = vrot.slane %v4829_v57, 5  ;;  %v464_v10 = vrot.slane %v4832_v58, 4  ;;  %v4852_v11 = vshrl.u32 %v4775_v61, 16  ;;  %3817 = vmatpush3.bf16.msra.mxu1 %v4729_v35 }
  0x85   : > { %6038 = vst [vmem:[#allocation18_spill] sm:$0xff] %v4840_v0  ;;  %3885 = vmatmul.mubr.msk.bf16.gmra.mrb[4].mxu0 %vm622_vm5, %v3580_v53  ;;  %v4855_v16 = vshll.u32 %v4784_v3, 16  ;;  %v445_v21 = vrot.slane %v444_v62, 4  ;;  %v454_v22 = vor.u32 %v453_v63, %v449_v54  ;;  %v467_v23 = vrot.slane %v4840_v0, 5  ;;  %6045 = vst [vmem:[#allocation25_spill] sm:$0xff] %v4867_v29  ;;  %3818 = vmatprep.subr.bf16.mxu1 %v4233_v41 }
  0x86   : > { %6039 = vst [vmem:[#allocation19_spill] sm:$0xff] %v4843_v2  ;;  %6041 = vst [vmem:[#allocation21_spill] sm:$0xff] %v4852_v11  ;;  %v473_v27 = vrot.slane %v4843_v2, 5  ;;  %v477_v32 = vrot.slane %v4852_v11, 4  ;;  %v3573_v36 = vrot.slane %v4846_v5, 10  ;;  %v1496_v37 = vrot.slane %v4824_v52, 6 }
  0x87   : > { %6042 = vst [vmem:[#allocation22_spill] sm:$0xff] %v4855_v16  ;;  %6046 = vst [vmem:[#allocation26_spill] sm:$0xff] %v4869_v31  ;;  %v483_v34 = vrot.slane %v4855_v16, 5  ;;  %v450_v35 = vsel %vm4747_vm6, %v445_v21, %v449_v54  ;;  %v455_v42 = vrot.slane %v454_v22, 4  ;;  %v468_v44 = vor.u32 %v467_v23, %v464_v10 }
  0x88   : > { %v1499_v46 = vrot.slane %v4835_v59, 6  ;;  %v478_v53 = vor.u32 %v477_v32, %v473_v27  ;;  %v1497_v62 = vsel %vm4674_vm2, %v3573_v36, %v1496_v37  ;;  %v1498_v63 = vrot.slane %v1496_v37, 4  ;;  %3819 = vmatpush3.bf16.msra.mxu1 %v4233_v41 }
  0x89   : > { %v3574_v55 = vrot.slane %v4867_v29, 10  ;;  %v460_v18 = vsel %vm4747_vm6, %v455_v42, %v459_v9  ;;  %v469_v60 = vrot.slane %v468_v44, 4  ;;  %v1503_v13 = vrot.slane %v4858_v19, 6  ;;  %3836 = vmatprep.subr.bf16.mxu1 %v4869_v31 }
  0x8a   : > { %v1506_v54 = vrot.slane %v4861_v20, 6  ;;  %v3491_v10 = vcombine.low %v450_v35, %v460_v18  ;;  %v479_v21 = vrot.slane %v478_v53, 4  ;;  %v1500_v22 = vsel %vm4674_vm2, %v1498_v63, %v1499_v46  ;;  %v4923_v63 = vld [vmem:[%s4664_s16 + $0x48] sm:$0xf] }
  0x8b   : > { %v4889_v23 = vshrl.u32 %v4846_v5, 16  ;;  %v474_v41 = vsel %vm4747_vm6, %v469_v60, %v473_v27  ;;  %v3581_v9 = vcombine.low %v1497_v62, %v1500_v22  ;;  %v1504_v32 = vsel %vm4674_vm2, %v3574_v55, %v1503_v13  ;;  %6054 = vst [vmem:[#allocation34_spill] sm:$0xff] %v4923_v63 }
  0x8c   : > { %v1505_v36 = vrot.slane %v1503_v13, 4  ;;  %3804 = vmatprep.mubr.msk.bf16.mxu1 %vm622_vm5, %v3491_v10  ;;  %v484_v18 = vsel %vm4747_vm6, %v479_v21, %v483_v34  ;;  %v4900_v35 = vshll.u32 %v4846_v5, 16  ;;  %v4903_v42 = vshll.u32 %v4824_v52, 16  ;;  %v4915_v34 = vld [vmem:[%s4664_s16 + $0x4c] sm:$0xf] }
  0x8d   : > { %6047 = vst [vmem:[#allocation27_spill] sm:$0xff] %v4889_v23  ;;  %v488_v37 = vrot.slane %v4889_v23, 4  ;;  %v3492_v60 = vcombine.low %v474_v41, %v484_v18  ;;  %3888 = vmatprep.mubr.msk.bf16.mxu0 %vm622_vm5, %v3581_v9  ;;  %v4909_v13 = vshrl.u32 %v4824_v52, 16  ;;  %v4912_v27 = vshll.u32 %v4835_v59, 16  ;;  %6052 = vst [vmem:[#allocation32_spill] sm:$0xff] %v4915_v34 }
  0x8e   : > { %6048 = vst [vmem:[#allocation28_spill] sm:$0xff] %v4900_v35  ;;  %6049 = vst [vmem:[#allocation29_spill] sm:$0xff] %v4903_v42  ;;  %v1507_v55 = vsel %vm4674_vm2, %v1505_v36, %v1506_v54  ;;  %v491_v46 = vrot.slane %v4900_v35, 5  ;;  %v497_v53 = vrot.slane %v4903_v42, 5  ;;  %v4920_v62 = vshrl.u32 %v4867_v29, 16 }
  0x8f   : > { %6050 = vst [vmem:[#allocation30_spill] sm:$0xff] %v4909_v13  ;;  %6051 = vst [vmem:[#allocation31_spill] sm:$0xff] %v4912_v27  ;;  %v3582_v44 = vcombine.low %v1504_v32, %v1507_v55  ;;  %v4926_v54 = vld [vmem:[%s4664_s16 + $0x50] sm:$0xf]  ;;  %3805 = vmatmul.mubr.msk.bf16.gmra.mrb[4].mxu1 %vm622_vm5, %v3492_v60  ;;  %v501_v10 = vrot.slane %v4909_v13, 4  ;;  %v507_v21 = vrot.slane %v4912_v27, 5 }
  0x90   : > { %6053 = vst [vmem:[#allocation33_spill] sm:$0xff] %v4920_v62  ;;  %v4932_v22 = vshll.u32 %v4867_v29, 16  ;;  %v4935_v41 = vshll.u32 %v4858_v19, 16  ;;  %v492_v9 = vor.u32 %v491_v46, %v488_v37  ;;  %v512_v32 = vrot.slane %v4920_v62, 4  ;;  %v4946_v60 = vld [vmem:[%s4664_s16 + $0x54] sm:$0xf] }
  0x91   : > { %3889 = vmatmul.mubr.msk.bf16.gmra.mrb[8].mxu0 %vm622_vm5, %v3582_v44  ;;  %v4940_v36 = vshrl.u32 %v4858_v19, 16  ;;  %v4943_v18 = vshll.u32 %v4861_v20, 16  ;;  %6059 = vst [vmem:[#allocation39_spill] sm:$0xff] %v4946_v60  ;;  %v4949_v55 = vld [vmem:[%s4664_s16 + $0x58] sm:$0xf]  ;;  %v502_v5 = vor.u32 %v501_v10, %v497_v53  ;;  %v3575_v37 = vrot.slane %v4923_v63, 10 }
  0x92   : > { %6055 = vst [vmem:[#allocation35_spill] sm:$0xff] %v4932_v22  ;;  %6056 = vst [vmem:[#allocation36_spill] sm:$0xff] %v4935_v41  ;;  %v4952_v29 = vld [vmem:[%s4664_s16 + $0x5c] sm:$0xf]  ;;  %v515_v52 = vrot.slane %v4932_v22, 5  ;;  %v521_v44 = vrot.slane %v4935_v41, 5 }
  0x93   : > { %6057 = vst [vmem:[#allocation37_spill] sm:$0xff] %v4940_v36  ;;  %6058 = vst [vmem:[#allocation38_spill] sm:$0xff] %v4943_v18  ;;  %v493_v46 = vrot.slane %v492_v9, 4  ;;  %v525_v19 = vrot.slane %v4940_v36, 4  ;;  %v531_v62 = vrot.slane %v4943_v18, 5  ;;  %v1510_v20 = vrot.slane %v4915_v34, 6 }
  0x94   : > { %6060 = vst [vmem:[#allocation40_spill] sm:$0xff] %v4949_v55  ;;  %v503_v27 = vrot.slane %v502_v5, 4  ;;  %v516_v42 = vor.u32 %v515_v52, %v512_v32  ;;  %v1513_v31 = vrot.slane %v4926_v54, 6  ;;  %v3576_v13 = vrot.slane %v4946_v60, 10 }
  0x95   : > { %v498_v10 = vsel %vm4747_vm6, %v493_v46, %v497_v53  ;;  %v526_v22 = vor.u32 %v525_v19, %v521_v44  ;;  %v1511_v41 = vsel %vm4674_vm2, %v3575_v37, %v1510_v20  ;;  %v1512_v9 = vrot.slane %v1510_v20, 4 }
  0x96   : > { %v508_v36 = vsel %vm4747_vm6, %v503_v27, %v507_v21  ;;  %v517_v18 = vrot.slane %v516_v42, 4  ;;  %v1517_v35 = vrot.slane %v4949_v55, 6  ;;  %v1520_v52 = vrot.slane %v4952_v29, 6 }
  0x97   : > { %v3493_v5 = vcombine.low %v498_v10, %v508_v36  ;;  %v527_v32 = vrot.slane %v526_v22, 4  ;;  %v1514_v23 = vsel %vm4674_vm2, %v1512_v9, %v1513_v31  ;;  %v4973_v53 = vshrl.u32 %v4923_v63, 16 }
  0x98   : > { %v522_v19 = vsel %vm4747_vm6, %v517_v18, %v521_v44  ;;  %v3583_v20 = vcombine.low %v1511_v41, %v1514_v23  ;;  %v1518_v27 = vsel %vm4674_vm2, %v3576_v13, %v1517_v35  ;;  %v1519_v42 = vrot.slane %v1517_v35, 4 }
  0x99   : > { %vm1701_vm8 = vsmask.f32 5392  ;;  %3808 = vmatprep.mubr.msk.bf16.mxu1 %vm622_vm5, %v3493_v5  ;;  %v532_v21 = vsel %vm4747_vm6, %v527_v32, %v531_v62  ;;  %v536_v31 = vrot.slane %v4973_v53, 4  ;;  %v4984_v22 = vshll.u32 %v4923_v63, 16 }
  0x9a   : > { %v4987_v36 = vshll.u32 %v4915_v34, 16  ;;  %v3494_v23 = vcombine.low %v522_v19, %v532_v21  ;;  %3892 = vmatprep.mubr.msk.bf16.mxu0 %vm622_vm5, %v3583_v20  ;;  %v1521_v35 = vsel %vm4674_vm2, %v1519_v42, %v1520_v52  ;;  %v4993_v13 = vshrl.u32 %v4915_v34, 16  ;;  %vm5039_vm9 = vmor %vm1700_vm7, %vm1701_vm8 }
  0x9b   : > { %6061 = vst [vmem:[#allocation41_spill] sm:$0xff] %v4984_v22  ;;  %v4996_v41 = vshll.u32 %v4926_v54, 16  ;;  %v3584_v62 = vcombine.low %v1518_v27, %v1521_v35  ;;  %v539_v18 = vrot.slane %v4984_v22, 5  ;;  %v5001_v37 = vshrl.u32 %v4946_v60, 16 }
  0x9c   : > { %6062 = vst [vmem:[#allocation42_spill] sm:$0xff] %v4987_v36  ;;  %6063 = vst [vmem:[#allocation43_spill] sm:$0xff] %v4993_v13  ;;  %v545_v44 = vrot.slane %v4987_v36, 5  ;;  %3809 = vmatmul.mubr.msk.bf16.gmra.mrb[8].mxu1 %vm622_vm5, %v3494_v23  ;;  %v549_v46 = vrot.slane %v4993_v13, 4  ;;  %v5007_v10 = vshll.u32 %v4946_v60, 16  ;;  %v5010_v9 = vshll.u32 %v4949_v55, 16 }
  0x9d   : > { %6064 = vst [vmem:[#allocation44_spill] sm:$0xff] %v4996_v41  ;;  %6065 = vst [vmem:[#allocation45_spill] sm:$0xff] %v5001_v37  ;;  %v555_v1 = vrot.slane %v4996_v41, 5  ;;  %3893 = vmatmul.mubr.msk.bf16.gmra.mrb[12].mxu0 %vm622_vm5, %v3584_v62  ;;  %v540_v52 = vor.u32 %v539_v18, %v536_v31  ;;  %v560_v5 = vrot.slane %v5001_v37, 4  ;;  %v5015_v32 = vshrl.u32 %v4949_v55, 16 }
  0x9e   : > { %6066 = vst [vmem:[#allocation46_spill] sm:$0xff] %v5007_v10  ;;  %6067 = vst [vmem:[#allocation47_spill] sm:$0xff] %v5010_v9  ;;  %v5018_v19 = vshll.u32 %v4952_v29, 16  ;;  %v550_v20 = vor.u32 %v549_v46, %v545_v44  ;;  %v563_v27 = vrot.slane %v5007_v10, 5  ;;  %v569_v42 = vrot.slane %v5010_v9, 5 }
  0x9f   : > { %6068 = vst [vmem:[#allocation48_spill] sm:$0xff] %v5015_v32  ;;  %v5023_v21 = vshrl.u32 %v4685_v8, 16  ;;  %v541_v23 = vrot.slane %v540_v52, 4  ;;  %v573_v35 = vrot.slane %v5015_v32, 4  ;;  %v1703_v62 = vrot.slane %v4701_v17, 6 }
  0xa0   : > { %6069 = vst [vmem:[#allocation49_spill] sm:$0xff] %v5018_v19  ;;  %v579_v31 = vrot.slane %v5018_v19, 5  ;;  %v551_v18 = vrot.slane %v550_v20, 4  ;;  %v564_v60 = vor.u32 %v563_v27, %v560_v5  ;;  %v1704_v55 = vrot.slane %v4711_v24, 7 }
  0xa1   : > { %v1707_v46 = vrot.slane %v4717_v26, 6  ;;  %v546_v63 = vsel %vm4747_vm6, %v541_v23, %v545_v44  ;;  %v574_v34 = vor.u32 %v573_v35, %v569_v42  ;;  %v1708_v8 = vrot.slane %v4714_v25, 7 }
  0xa2   : > { %v1712_v52 = vrot.slane %v5023_v21, 6  ;;  %v556_v9 = vsel %vm4747_vm6, %v551_v18, %v555_v1  ;;  %v565_v19 = vrot.slane %v564_v60, 4  ;;  %v1705_v32 = vor.u32 %v1704_v55, %v1703_v62 }
  0xa3   : > { %v1713_v20 = vrot.slane %v4724_v30, 7  ;;  %v3495_v5 = vcombine.low %v546_v63, %v556_v9  ;;  %v575_v27 = vrot.slane %v574_v34, 4  ;;  %v1709_v44 = vor.u32 %v1708_v8, %v1707_v46 }
  0xa4   : > { %v5044_v23 = vshrl.u32 %v4697_v15, 16  ;;  %v570_v35 = vsel %vm4747_vm6, %v565_v19, %v569_v42  ;;  %v1706_v1 = vrot.slane %v1705_v32, 4  ;;  %v1716_v55 = vrot.slane %v4735_v38, 6 }
  0xa5   : > { %v1714_v60 = vor.u32 %v1713_v20, %v1712_v52  ;;  %3812 = vmatprep.mubr.msk.bf16.mxu1 %vm622_vm5, %v3495_v5  ;;  %v580_v34 = vsel %vm4747_vm6, %v575_v27, %v579_v31  ;;  %v1711_v63 = vrot.slane %v1709_v44, 4  ;;  %v1720_v9 = vrot.slane %v4754_v48, 6 }
  0xa6   : > { %v1721_v8 = vrot.slane %v4742_v43, 7  ;;  %v3496_v62 = vcombine.low %v570_v35, %v580_v34  ;;  %v1710_v18 = vsel %vm5039_vm9, %v1706_v1, %v1709_v44  ;;  %v6072_v19 = vrot.slane %v4738_v39, 7 }
  0xa7   : > { %v1725_v42 = vrot.slane %v5044_v23, 6  ;;  %v1715_v46 = vsel %vm5039_vm9, %v1711_v63, %v1714_v60  ;;  %v1726_v45 = vrot.slane %v4757_v49, 7  ;;  %v3508_v31 = vcombine.low %v4691_v12, %v4694_v14 }
  0xa8   : > { %v1718_v32 = vor.u32 %v6072_v19, %v1716_v55  ;;  %v1722_v52 = vor.u32 %v1721_v8, %v1720_v9  ;;  %3813 = vmatmul.mubr.msk.bf16.gmra.mrb[12].mxu1 %vm622_vm5, %v3496_v62  ;;  %v3595_v20 = vcombine.low %v1710_v18, %v1715_v46  ;;  %v5066_v27 = vshrl.u32 %v4769_v56, 16 }
  0xa9   : > { %v1729_v44 = vrot.slane %v4801_v28, 6  ;;  %v1727_v1 = vor.u32 %v1726_v45, %v1725_v42  ;;  %v6073_v60 = vcombine.low %v4679_v6, %v4682_v7  ;;  %v1730_v55 = vrot.slane %v4808_v33, 7 }
  0xaa   : > { %v1719_v5 = vrot.slane %v1718_v32, 4  ;;  %v1724_v35 = vrot.slane %v1722_v52, 4  ;;  %v1733_v34 = vrot.slane %v4821_v47, 6  ;;  %3900 = vmatprep.mubr.msk.bf16.mxu0 %vm622_vm5, %v3595_v20  ;;  %v1734_v9 = vrot.slane %v4815_v40, 7 }
  0xab   : > { %3820 = vmatprep.mubr.msk.bf16.mxu1 %vm622_vm5, %v6073_v60  ;;  %v1738_v8 = vrot.slane %v5066_v27, 6  ;;  %v1739_v62 = vrot.slane %v4829_v57, 7  ;;  %v1731_v19 = vor.u32 %v1730_v55, %v1729_v44  ;;  %v5084_v32 = vshrl.u32 %v4784_v3, 16 }
  0xac   : > { %v1723_v63 = vsel %vm5039_vm9, %v1719_v5, %v1722_v52  ;;  %v1728_v18 = vsel %vm5039_vm9, %v1724_v35, %v1727_v1  ;;  %v1742_v42 = vrot.slane %v4832_v58, 6  ;;  %v1735_v45 = vor.u32 %v1734_v9, %v1733_v34  ;;  %v4239_v5 = vld [vmem:[#allocation5 + $0x68] sm:$0xff]  }
  0xad   : > { %6074 = vst [vmem:[#allocation50_spill] sm:$0xff] %v5084_v32  ;;  %v3596_v46 = vcombine.low %v1723_v63, %v1728_v18  ;;  %v1740_v20 = vor.u32 %v1739_v62, %v1738_v8  ;;  %v1743_v52 = vrot.slane %v4840_v0, 7  ;;  %v1732_v60 = vrot.slane %v1731_v19, 4  ;;  %v4245_v34 = vld [vmem:[#allocation5 + $0x28] sm:$0xff]   ;;  %v6075_v8 = vld [vmem:[#allocation12_spill] sm:$0xff] }
  0xae   : > { %v1746_v33 = vrot.slane %v4852_v11, 6  ;;  %v1747_v57 = vrot.slane %v4843_v2, 7  ;;  %v1751_v40 = vrot.slane %v5084_v32, 6  ;;  %v1737_v44 = vrot.slane %v1735_v45, 4  ;;  %v6080_v32 = vld [vmem:[#allocation26_spill] sm:$0xff]  ;;  %v6087_v11 = vld [vmem:[#allocation37_spill] sm:$0xff] }
  0xaf   : > { %3901 = vmatmul.mubr.msk.bf16.vlgmr.msra.gmra.mrb[0].mxu0 %vm622_vm5, %v3596_v46  ;;  %v1744_v35 = vor.u32 %v1743_v52, %v1742_v42  ;;  %v1752_v1 = vrot.slane %v4855_v16, 7  ;;  %v3509_v55 = vcombine.low %v4760_v50, %v4763_v51  ;;  %v1736_v63 = vsel %vm5039_vm9, %v1732_v60, %v1735_v45  ;;  %v6077_v52 = vld [vmem:[#allocation27_spill] sm:$0xff]  ;;  %v6079_v16 = vld [vmem:[#allocation30_spill] sm:$0xff] }
  0xb0   : > { %3917 = vmatpush3.bf16.msra.mxu0 %v4786_v4  ;;  %v1748_v9 = vor.u32 %v1747_v57, %v1746_v33  ;;  %v3510_v62 = vcombine.low %v6075_v8, %v4775_v61  ;;  %v5101_v18 = vshrl.u32 %v4835_v59, 16  ;;  %3821 = vmatmul.mubr.msk.bf16.vlgmr.msra.gmra.mrb[0].mxu1 %vm622_vm5, %v3508_v31  ;;  %v1741_v19 = vsel %vm5039_vm9, %v1737_v44, %v1740_v20  ;;  %v5107_v4 = vld [vmem:[#allocation5 + $0x70] sm:$0xff]   ;;  %v6078_v57 = vld [vmem:[#allocation28_spill] sm:$0xff]  ;;  %v6081_v20 = vld [vmem:[#allocation29_spill] sm:$0xff] }
  0xb1   : > { %v1745_v42 = vrot.slane %v1744_v35, 4  ;;  %v1753_v46 = vor.u32 %v1752_v1, %v1751_v40  ;;  %v1755_v0 = vrot.slane %v6077_v52, 6  ;;  %3918 = vmatprep.subr.bf16.mxu0 %v4239_v5  ;;  %v3597_v45 = vcombine.low %v1736_v63, %v1741_v19  ;;  %3824 = vmatprep.mubr.msk.bf16.mxu1 %vm622_vm5, %v3509_v55  ;;  %v6082_v35 = vld [vmem:[#allocation31_spill] sm:$0xff]  ;;  %v5118_v63 = vld [vmem:[#allocation5 + $0x30] sm:$0xff]  }
  0xb2   : > { %6076 = vst [vmem:[#allocation12_spill] sm:$0xff] %v5101_v18  ;;  %v1750_v33 = vrot.slane %v1748_v9, 4  ;;  %v1756_v60 = vrot.slane %v6078_v57, 7  ;;  %v1759_v2 = vrot.slane %v6079_v16, 6  ;;  %3837 = vmatpush3.bf16.msra.mxu1 %v6080_v32  ;;  %v1760_v40 = vrot.slane %v6081_v20, 7  ;;  %v6083_v57 = vld [vmem:[#allocation24_spill] sm:$0xff] }
  0xb3   : > { %v1749_v31 = vsel %vm5039_vm9, %v1745_v42, %v1748_v9  ;;  %v1764_v44 = vrot.slane %v5101_v18, 6  ;;  %v1765_v1 = vrot.slane %v6082_v35, 7  ;;  %3838 = vmatprep.subr.bf16.mxu1 %v4245_v34  ;;  %3904 = vmatprep.mubr.msk.bf16.mxu0 %vm622_vm5, %v3597_v45  ;;  %v5124_v32 = vshrl.u32 %v6083_v57, 16  ;;  %v6085_v16 = vld [vmem:[#allocation33_spill] sm:$0xff]  ;;  %v6086_v52 = vld [vmem:[#allocation35_spill] sm:$0xff] }
  0xb4   : > { %v1754_v55 = vsel %vm5039_vm9, %v1750_v33, %v1753_v46  ;;  %v1757_v19 = vor.u32 %v1756_v60, %v1755_v0  ;;  %v1768_v9 = vrot.slane %v6085_v16, 6  ;;  %3919 = vmatpush3.bf16.msra.mxu0 %v4239_v5  ;;  %v1761_v20 = vor.u32 %v1760_v40, %v1759_v2  ;;  %v6088_v46 = vld [vmem:[#allocation36_spill] sm:$0xff]  ;;  %v6089_v2 = vld [vmem:[#allocation38_spill] sm:$0xff]  ;;  %v6090_v40 = vld [vmem:[#allocation15_spill] sm:$0xff] }
  0xb5   : > { %6084 = vst [vmem:[#allocation26_spill] sm:$0xff] %v5124_v32  ;;  %v3598_v42 = vcombine.low %v1749_v31, %v1754_v55  ;;  %v1766_v18 = vor.u32 %v1765_v1, %v1764_v44  ;;  %v1769_v35 = vrot.slane %v6086_v52, 7  ;;  %vm1986_vm11 = vcmask 1044484   ;;  %3936 = vmatprep.subr.bf16.mxu0 %v5107_v4  ;;  %v6091_v44 = vld [vmem:[#allocation20_spill] sm:$0xff]  ;;  %v6092_v52 = vld [vmem:[#allocation23_spill] sm:$0xff] }
  0xb6   : > { %v1758_v45 = vrot.slane %v1757_v19, 4  ;;  %v1772_v58 = vrot.slane %v6087_v11, 6  ;;  %v1773_v0 = vrot.slane %v6088_v46, 7  ;;  %v1777_v33 = vrot.slane %v5124_v32, 6  ;;  %3839 = vmatpush3.bf16.msra.mxu1 %v4245_v34  ;;  %v6093_v46 = vld [vmem:[#allocation25_spill] sm:$0xff]  ;;  %vm5177_vm14 = vmor %vm1985_vm10, %vm1986_vm11 }
  0xb7   : > { %3905 = vmatmul.mubr.msk.bf16.gmra.mrb[4].mxu0 %vm622_vm5, %v3598_v42  ;;  %v1763_v5 = vrot.slane %v1761_v20, 4  ;;  %v1770_v60 = vor.u32 %v1769_v35, %v1768_v9  ;;  %v1778_v31 = vrot.slane %v6089_v2, 7  ;;  %v3511_v1 = vcombine.low %v6091_v44, %v6090_v40  ;;  %3856 = vmatprep.subr.bf16.mxu1 %v5118_v63 }
  0xb8   : > { %v1762_v55 = vsel %vm5039_vm9, %v1758_v45, %v1761_v20  ;;  %v1774_v19 = vor.u32 %v1773_v0, %v1772_v58  ;;  %v3512_v11 = vcombine.low %v6093_v46, %v6092_v52  ;;  %v5142_v34 = vshrl.u32 %v4926_v54, 16  ;;  %3825 = vmatmul.mubr.msk.bf16.gmra.mrb[4].mxu1 %vm622_vm5, %v3510_v62 }
  0xb9   : > { %vm925_vm12 = vcmask 1042432   ;;  %vm926_vm13 = vcmask 1046532   ;;  %v1767_v35 = vsel %vm5039_vm9, %v1763_v5, %v1766_v18  ;;  %v1771_v9 = vrot.slane %v1770_v60, 4  ;;  %3828 = vmatprep.mubr.msk.bf16.mxu1 %vm622_vm5, %v3511_v1 }
  0xba   : > { %6094 = vst [vmem:[#allocation24_spill] sm:$0xff] %v5142_v34  ;;  %v1779_v42 = vor.u32 %v1778_v31, %v1777_v33  ;;  %v1781_v2 = vrot.slane %v4973_v53, 6  ;;  %v3599_v32 = vcombine.low %v1762_v55, %v1767_v35  ;;  %v1776_v20 = vrot.slane %v1774_v19, 4  ;;  %vm5196_vm15 = vmor %vm925_vm12, %vm926_vm13 }
  0xbb   : > { %v1782_v58 = vrot.slane %v4984_v22, 7  ;;  %v1785_v45 = vrot.slane %v4993_v13, 6  ;;  %v1775_v0 = vsel %vm5039_vm9, %v1771_v9, %v1774_v19  ;;  %v1786_v62 = vrot.slane %v4987_v36, 7  ;;  %v6096_v22 = vld [vmem:[#allocation48_spill] sm:$0xff] }
  0xbc   : > { %v1790_v16 = vrot.slane %v5142_v34, 6  ;;  %v1791_v18 = vrot.slane %v4996_v41, 7  ;;  %3908 = vmatprep.mubr.msk.bf16.mxu0 %vm622_vm5, %v3599_v32  ;;  %v1780_v33 = vsel %vm5039_vm9, %v1776_v20, %v1779_v42  ;;  %v5160_v60 = vshrl.u32 %v4952_v29, 16  ;;  %v6097_v41 = vld [vmem:[#allocation47_spill] sm:$0xff]  ;;  %v6098_v20 = vld [vmem:[#allocation49_spill] sm:$0xff]  ;;  %v6099_v13 = vld [vmem:[#allocation32_spill] sm:$0xff] }
  0xbd   : > { %v1783_v5 = vor.u32 %v1782_v58, %v1781_v2  ;;  %v1794_v31 = vrot.slane %v5001_v37, 6  ;;  %v3600_v1 = vcombine.low %v1775_v0, %v1780_v33  ;;  %v1787_v55 = vor.u32 %v1786_v62, %v1785_v45  ;;  %v6100_v37 = vld [vmem:[#allocation34_spill] sm:$0xff]  ;;  %v6101_v62 = vld [vmem:[#allocation40_spill] sm:$0xff] }
  0xbe   : > { %6095 = vst [vmem:[#allocation15_spill] sm:$0xff] %v5160_v60  ;;  %v1792_v19 = vor.u32 %v1791_v18, %v1790_v16  ;;  %v1795_v35 = vrot.slane %v5007_v10, 7  ;;  %v1798_v36 = vrot.slane %v6096_v22, 6  ;;  %v1799_v34 = vrot.slane %v6097_v41, 7  ;;  %v6102_v18 = vld [vmem:[#allocation39_spill] sm:$0xff] }
  0xbf   : > { %v1784_v9 = vrot.slane %v1783_v5, 4  ;;  %v1803_v32 = vrot.slane %v5160_v60, 6  ;;  %3909 = vmatmul.mubr.msk.bf16.gmra.mrb[8].mxu0 %vm622_vm5, %v3600_v1  ;;  %v1789_v2 = vrot.slane %v1787_v55, 4  ;;  %v1804_v58 = vrot.slane %v6098_v20, 7 }
  0xc0   : > { %v1796_v42 = vor.u32 %v1795_v35, %v1794_v31  ;;  %v3513_v0 = vcombine.low %v6100_v37, %v6099_v13  ;;  %v1800_v45 = vor.u32 %v1799_v34, %v1798_v36  ;;  %v3514_v33 = vcombine.low %v6102_v18, %v6101_v62  ;;  %3829 = vmatmul.mubr.msk.bf16.gmra.mrb[8].mxu1 %vm622_vm5, %v3512_v11 }
  0xc1   : > { %v1788_v16 = vsel %vm5039_vm9, %v1784_v9, %v1787_v55  ;;  %v3613_v31 = vrot.slane %v4679_v6, 11  ;;  %v1793_v1 = vsel %vm5039_vm9, %v1789_v2, %v1792_v19  ;;  %v1805_v10 = vor.u32 %v1804_v58, %v1803_v32  ;;  %v6105_v9 = vld [vmem:[#allocation10_spill] sm:$0xff] }
  0xc2   : > { %v1797_v35 = vrot.slane %v1796_v42, 4  ;;  %v1990_v36 = vrot.slane %v4682_v7, 7  ;;  %v3601_v34 = vcombine.low %v1788_v16, %v1793_v1  ;;  %v1802_v55 = vrot.slane %v1800_v45, 4  ;;  %3832 = vmatprep.mubr.msk.bf16.mxu1 %vm622_vm5, %v3513_v0 }
  0xc3   : > { %v1993_v20 = vrot.slane %v6105_v9, 7  ;;  %v3614_v41 = vrot.slane %v4691_v12, 11  ;;  %v1997_v19 = vrot.slane %v4694_v14, 7  ;;  %v2000_v42 = vrot.slane %v4697_v15, 7 }
  0xc4   : > { %v1801_v60 = vsel %vm5039_vm9, %v1797_v35, %v1800_v45  ;;  %v1991_v11 = vsel %vm5177_vm14, %v3613_v31, %v1990_v36  ;;  %v1992_v22 = vrot.slane %v1990_v36, 4  ;;  %3912 = vmatprep.mubr.msk.bf16.mxu0 %vm622_vm5, %v3601_v34  ;;  %v1806_v2 = vsel %vm5039_vm9, %v1802_v55, %v1805_v10 }
  0xc5   : > { %v3525_v58 = vrot.slane %v4679_v6, 9  ;;  %v930_v0 = vrot.slane %v4682_v7, 5  ;;  %v3602_v16 = vcombine.low %v1801_v60, %v1806_v2  ;;  %v1998_v31 = vsel %vm5177_vm14, %v3614_v41, %v1997_v19 }
  0xc6   : > { %v1994_v45 = vsel %vm5177_vm14, %v1992_v22, %v1993_v20  ;;  %v1999_v1 = vrot.slane %v1997_v19, 4  ;;  %v933_v10 = vrot.slane %v6105_v9, 5  ;;  %v3526_v7 = vrot.slane %v4691_v12, 9 }
  0xc7   : > { %v3621_v35 = vcombine.low %v1991_v11, %v1994_v45  ;;  %v931_v36 = vsel %vm5196_vm15, %v3525_v58, %v930_v0  ;;  %v932_v24 = vrot.slane %v930_v0, 4  ;;  %3913 = vmatmul.mubr.msk.bf16.gmra.mrb[12].mxu0 %vm622_vm5, %v3602_v16  ;;  %v937_v22 = vrot.slane %v4694_v14, 5 }
  0xc8   : > { %v2001_v6 = vsel %vm5177_vm14, %v1999_v1, %v2000_v42  ;;  %v940_v60 = vrot.slane %v4697_v15, 5  ;;  %v3615_v34 = vrot.slane %v4760_v50, 11  ;;  %v2004_v55 = vrot.slane %v4763_v51, 7  ;;  %3833 = vmatmul.mubr.msk.bf16.gmra.mrb[12].mxu1 %vm622_vm5, %v3514_v33 }
  0xc9   : > { %3920 = vmatprep.mubr.msk.bf16.mxu0 %vm622_vm5, %v3621_v35  ;;  %v3622_v41 = vcombine.low %v1998_v31, %v2001_v6  ;;  %v934_v20 = vsel %vm5196_vm15, %v932_v24, %v933_v10  ;;  %v938_v12 = vsel %vm5196_vm15, %v3526_v7, %v937_v22  ;;  %v939_v11 = vrot.slane %v937_v22, 4  ;;  %v4247_v7 = vld [vmem:[#allocation5 + $0x78] sm:$0xff]  }
  0xca   : > { %v3533_v9 = vcombine.low %v931_v36, %v934_v20  ;;  %v2007_v14 = vrot.slane %v4769_v56, 7  ;;  %v2005_v15 = vsel %vm5177_vm14, %v3615_v34, %v2004_v55  ;;  %v2006_v19 = vrot.slane %v2004_v55, 4 }
  0xcb   : > { %v3616_v2 = vrot.slane %v6075_v8, 11  ;;  %v2011_v42 = vrot.slane %v4775_v61, 7  ;;  %v941_v33 = vsel %vm5196_vm15, %v939_v11, %v940_v60  ;;  %v2014_v58 = vrot.slane %v4784_v3, 7 }
  0xcc   : > { %3840 = vmatprep.mubr.msk.bf16.mxu1 %vm622_vm5, %v3533_v9  ;;  %v3527_v0 = vrot.slane %v4760_v50, 9  ;;  %v944_v16 = vrot.slane %v4763_v51, 5  ;;  %v3534_v45 = vcombine.low %v938_v12, %v941_v33  ;;  %v2008_v31 = vsel %vm5177_vm14, %v2006_v19, %v2007_v14  ;;  %v4249_v9 = vld [vmem:[#allocation5 + $0x38] sm:$0xff]  }
  0xcd   : > { %v2012_v1 = vsel %vm5177_vm14, %v3616_v2, %v2011_v42  ;;  %v2013_v35 = vrot.slane %v2011_v42, 4  ;;  %v3623_v36 = vcombine.low %v2005_v15, %v2008_v31  ;;  %v947_v6 = vrot.slane %v4769_v56, 5 }
  0xce   : > { %v945_v24 = vsel %vm5196_vm15, %v3527_v0, %v944_v16  ;;  %v946_v10 = vrot.slane %v944_v16, 4  ;;  %v3528_v51 = vrot.slane %v6075_v8, 9  ;;  %v951_v22 = vrot.slane %v4775_v61, 5 }
  0xcf   : > { %v2015_v50 = vsel %vm5177_vm14, %v2013_v35, %v2014_v58  ;;  %v954_v60 = vrot.slane %v4784_v3, 5  ;;  %3921 = vmatmul.mubr.msk.bf16.vlgmr.msra.gmra.mrb[0].mxu0 %vm622_vm5, %v3622_v41  ;;  %v3617_v55 = vrot.slane %v6091_v44, 11  ;;  %v2018_v56 = vrot.slane %v6090_v40, 7 }
  0xd0   : > { %v3624_v20 = vcombine.low %v2012_v1, %v2015_v50  ;;  %v948_v34 = vsel %vm5196_vm15, %v946_v10, %v947_v6  ;;  %3937 = vmatpush3.bf16.msra.mxu0 %v5107_v4  ;;  %3924 = vmatprep.mubr.msk.bf16.mxu0 %vm622_vm5, %v3623_v36  ;;  %v952_v61 = vsel %vm5196_vm15, %v3528_v51, %v951_v22  ;;  %v953_v3 = vrot.slane %v951_v22, 4  ;;  %v5265_v4 = vld [vmem:[#allocation5 + $0x80] sm:$0xff]  }
  0xd1   : > { %v3535_v8 = vcombine.low %v945_v24, %v948_v34  ;;  %v2021_v41 = vrot.slane %v4835_v59, 7  ;;  %3841 = vmatmul.mubr.msk.bf16.vlgmr.msra.gmra.mrb[0].mxu1 %vm622_vm5, %v3534_v45  ;;  %v2019_v12 = vsel %vm5177_vm14, %v3617_v55, %v2018_v56  ;;  %v2020_v11 = vrot.slane %v2018_v56, 4  ;;  %3938 = vmatprep.subr.bf16.mxu0 %v4247_v7 }
  0xd2   : > { %v3618_v14 = vrot.slane %v6093_v46, 11  ;;  %v2025_v15 = vrot.slane %v6092_v52, 7  ;;  %v955_v19 = vsel %vm5196_vm15, %v953_v3, %v954_v60  ;;  %v2028_v2 = vrot.slane %v6083_v57, 7  ;;  %3857 = vmatpush3.bf16.msra.mxu1 %v5118_v63 }
  0xd3   : > { %3844 = vmatprep.mubr.msk.bf16.mxu1 %vm622_vm5, %v3535_v8  ;;  %v3529_v42 = vrot.slane %v6091_v44, 9  ;;  %v958_v33 = vrot.slane %v6090_v40, 5  ;;  %v3536_v58 = vcombine.low %v952_v61, %v955_v19  ;;  %v2022_v0 = vsel %vm5177_vm14, %v2020_v11, %v2021_v41  ;;  %3858 = vmatprep.subr.bf16.mxu1 %v4249_v9 }
  0xd4   : > { %v2026_v16 = vsel %vm5177_vm14, %v3618_v14, %v2025_v15  ;;  %v2027_v45 = vrot.slane %v2025_v15, 4  ;;  %vm2222_vm0 = vsmask.f32 256  ;;  %vm2223_vm1 = vsmask.f32 4368  ;;  %3939 = vmatpush3.bf16.msra.mxu0 %v4247_v7 }
  0xd5   : > { %v3625_v31 = vcombine.low %v2019_v12, %v2022_v0  ;;  %v959_v1 = vsel %vm5196_vm15, %v3529_v42, %v958_v33  ;;  %v960_v44 = vrot.slane %v958_v33, 4  ;;  %v961_v40 = vrot.slane %v4835_v59, 5  ;;  %3956 = vmatprep.subr.bf16.mxu0 %v5265_v4  ;;  %vm5327_vm4 = vmor %vm2222_vm0, %vm2223_vm1 }
  0xd6   : > { %v2029_v63 = vsel %vm5177_vm14, %v2027_v45, %v2028_v2  ;;  %v3530_v35 = vrot.slane %v6093_v46, 9  ;;  %v965_v36 = vrot.slane %v6092_v52, 5  ;;  %v968_v24 = vrot.slane %v6083_v57, 5  ;;  %3859 = vmatpush3.bf16.msra.mxu1 %v4249_v9 }
  0xd7   : > { %v3626_v10 = vcombine.low %v2026_v16, %v2029_v63  ;;  %v962_v6 = vsel %vm5196_vm15, %v960_v44, %v961_v40  ;;  %v3619_v50 = vrot.slane %v6100_v37, 11  ;;  %v2032_v59 = vrot.slane %v6099_v13, 7  ;;  %3925 = vmatmul.mubr.msk.bf16.gmra.mrb[4].mxu0 %vm622_vm5, %v3624_v20 }
  0xd8   : > { %v3537_v7 = vcombine.low %v959_v1, %v962_v6  ;;  %v966_v46 = vsel %vm5196_vm15, %v3530_v35, %v965_v36  ;;  %v967_v52 = vrot.slane %v965_v36, 4  ;;  %v2035_v57 = vrot.slane %v4926_v54, 7  ;;  %3928 = vmatprep.mubr.msk.bf16.mxu0 %vm622_vm5, %v3625_v31 }
  0xd9   : > { %v2033_v51 = vsel %vm5177_vm14, %v3619_v50, %v2032_v59  ;;  %v2034_v22 = vrot.slane %v2032_v59, 4  ;;  %v3620_v60 = vrot.slane %v6102_v18, 11  ;;  %v2039_v34 = vrot.slane %v6101_v62, 7  ;;  %3845 = vmatmul.mubr.msk.bf16.gmra.mrb[4].mxu1 %vm622_vm5, %v3536_v58  ;;  %v6110_v59 = vld [vmem:[#allocation11_spill] sm:$0xff] }
  0xda   : > { %v969_v20 = vsel %vm5196_vm15, %v967_v52, %v968_v24  ;;  %v2042_v55 = vrot.slane %v4952_v29, 7  ;;  %v3531_v56 = vrot.slane %v6100_v37, 9  ;;  %v972_v9 = vrot.slane %v6099_v13, 5  ;;  %3848 = vmatprep.mubr.msk.bf16.mxu1 %vm622_vm5, %v3537_v7 }
  0xdb   : > { %v3538_v8 = vcombine.low %v966_v46, %v969_v20  ;;  %v2036_v61 = vsel %vm5177_vm14, %v2034_v22, %v2035_v57  ;;  %v2040_v3 = vsel %vm5177_vm14, %v3620_v60, %v2039_v34  ;;  %v2041_v41 = vrot.slane %v2039_v34, 4 }
  0xdc   : > { %vm1162_vm2 = vsmask.f32 2304  ;;  %vm1163_vm3 = vsmask.f32 6416  ;;  %v3627_v12 = vcombine.low %v2033_v51, %v2036_v61  ;;  %v973_v11 = vsel %vm5196_vm15, %v3531_v56, %v972_v9 }
  0xdd   : > { %v974_v14 = vrot.slane %v972_v9, 4  ;;  %v975_v37 = vrot.slane %v4926_v54, 5  ;;  %v2043_v13 = vsel %vm5177_vm14, %v2041_v41, %v2042_v55  ;;  %v3532_v15 = vrot.slane %v6102_v18, 9  ;;  %vm5362_vm6 = vmor %vm1162_vm2, %vm1163_vm3 }
  0xde   : > { %v979_v19 = vrot.slane %v6101_v62, 5  ;;  %v982_v2 = vrot.slane %v4952_v29, 5  ;;  %v3628_v42 = vcombine.low %v2040_v3, %v2043_v13  ;;  %v3639_v58 = vrot.slane %v4701_v17, 11 }
  0xdf   : > { %v976_v33 = vsel %vm5196_vm15, %v974_v14, %v975_v37  ;;  %v2227_v0 = vrot.slane %v4717_v26, 7  ;;  %v2231_v29 = vrot.slane %v5023_v21, 7  ;;  %3929 = vmatmul.mubr.msk.bf16.gmra.mrb[8].mxu0 %vm622_vm5, %v3626_v10  ;;  %v3640_v31 = vrot.slane %v4735_v38, 11 }
  0xe0   : > { %v3539_v16 = vcombine.low %v973_v11, %v976_v33  ;;  %v980_v54 = vsel %vm5196_vm15, %v3532_v15, %v979_v19  ;;  %v981_v5 = vrot.slane %v979_v19, 4  ;;  %v2236_v1 = vrot.slane %v4754_v48, 7  ;;  %3932 = vmatprep.mubr.msk.bf16.mxu0 %vm622_vm5, %v3627_v12 }
  0xe1   : > { %v2228_v62 = vor.u32 %v2227_v0, %v4714_v25  ;;  %v2230_v45 = vrot.slane %v2227_v0, 4  ;;  %v2232_v40 = vor.u32 %v2231_v29, %v4724_v30  ;;  %v2240_v63 = vrot.slane %v5044_v23, 7  ;;  %3849 = vmatmul.mubr.msk.bf16.gmra.mrb[8].mxu1 %vm622_vm5, %v3538_v8 }
  0xe2   : > { %v983_v44 = vsel %vm5196_vm15, %v981_v5, %v982_v2  ;;  %v1165_v35 = vrot.slane %v4701_v17, 5  ;;  %v2237_v10 = vor.u32 %v2236_v1, %v4742_v43  ;;  %v2239_v6 = vrot.slane %v2236_v1, 4  ;;  %3852 = vmatprep.mubr.msk.bf16.mxu1 %vm622_vm5, %v3539_v16  ;;  %v6116_v16 = vld [vmem:[#allocation16_spill] sm:$0xff]  ;;  %v6117_v5 = vld [vmem:[#allocation21_spill] sm:$0xff] }
  0xe3   : > { %v3540_v36 = vcombine.low %v980_v54, %v983_v44  ;;  %v2229_v24 = vsel %vm5327_vm4, %v3639_v58, %v2228_v62  ;;  %v2233_v32 = vsel %vm5327_vm4, %v2230_v45, %v2232_v40  ;;  %v2241_v50 = vor.u32 %v2240_v63, %v4757_v49  ;;  %v6118_v62 = vld [vmem:[#allocation50_spill] sm:$0xff]  ;;  %v6119_v40 = vld [vmem:[#allocation13_spill] sm:$0xff] }
  0xe4   : > { %v1166_v7 = vrot.slane %v6110_v59, 6  ;;  %v1169_v17 = vrot.slane %v4717_v26, 5  ;;  %v3647_v46 = vcombine.low %v2229_v24, %v2233_v32  ;;  %v2238_v52 = vsel %vm5327_vm4, %v3640_v31, %v2237_v10  ;;  %v4314_v26 = vld [vmem:[%s4664_s16 + $0x28] sm:$0xf] }
  0xe5   : > { %v1170_v57 = vrot.slane %v4714_v25, 6  ;;  %v1176_v51 = vrot.slane %v5023_v21, 5  ;;  %v2242_v22 = vsel %vm5327_vm4, %v2239_v6, %v2241_v50  ;;  %v1177_v34 = vrot.slane %v4724_v30, 6  ;;  %v6121_v6 = vld [vmem:[#allocation22_spill] sm:$0xff]  ;;  %v4251_v50 = vld [vmem:[#allocation5 + $0x88] sm:$0xff]  }
  0xe6   : > { %v1167_v60 = vor.u32 %v1166_v7, %v1165_v35  ;;  %v1180_v20 = vrot.slane %v4735_v38, 5  ;;  %v3648_v55 = vcombine.low %v2238_v52, %v2242_v22  ;;  %v1184_v25 = vrot.slane %v4754_v48, 5 }
  0xe7   : > { %v1171_v56 = vor.u32 %v1170_v57, %v1169_v17  ;;  %v1185_v21 = vrot.slane %v4742_v43, 6  ;;  %v1178_v8 = vor.u32 %v1177_v34, %v1176_v51  ;;  %v6113_v61 = vrot.slane %v4738_v39, 6  ;;  %3933 = vmatmul.mubr.msk.bf16.gmra.mrb[12].mxu0 %vm622_vm5, %v3628_v42  ;;  %v6115_v42 = vld [vmem:[#allocation14_spill] sm:$0xff] }
  0xe8   : > { %v1168_v9 = vrot.slane %v1167_v60, 4  ;;  %v1191_v30 = vrot.slane %v5044_v23, 5  ;;  %v1192_v12 = vrot.slane %v4757_v49, 6  ;;  %v3641_v11 = vrot.slane %v4801_v28, 11  ;;  %3940 = vmatprep.mubr.msk.bf16.mxu0 %vm622_vm5, %v3647_v46  ;;  %v6114_v49 = vld [vmem:[#allocation17_spill] sm:$0xff] }
  0xe9   : > { %v1182_v3 = vor.u32 %v6113_v61, %v1180_v20  ;;  %v1173_v38 = vrot.slane %v1171_v56, 4  ;;  %v1186_v41 = vor.u32 %v1185_v21, %v1184_v25  ;;  %v2245_v14 = vrot.slane %v4821_v47, 7  ;;  %3853 = vmatmul.mubr.msk.bf16.gmra.mrb[12].mxu1 %vm622_vm5, %v3540_v36  ;;  %v6120_v36 = vld [vmem:[#allocation19_spill] sm:$0xff] }
  0xea   : > { %v1172_v43 = vsel %vm5362_vm6, %v1168_v9, %v1171_v56  ;;  %v2249_v39 = vrot.slane %v5066_v27, 7  ;;  %v1193_v13 = vor.u32 %v1192_v12, %v1191_v30  ;;  %v3642_v15 = vrot.slane %v6114_v49, 11  ;;  %v6123_v30 = vld [vmem:[#allocation27_spill] sm:$0xff] }
  0xeb   : > { %v1183_v48 = vrot.slane %v1182_v3, 4  ;;  %v1179_v23 = vsel %vm5362_vm6, %v1173_v38, %v1178_v8  ;;  %v1188_v37 = vrot.slane %v1186_v41, 4  ;;  %v2246_v33 = vor.u32 %v2245_v14, %v6115_v42 }
  0xec   : > { %v3551_v19 = vcombine.low %v1172_v43, %v1179_v23  ;;  %v2248_v58 = vrot.slane %v2245_v14, 4  ;;  %v2250_v54 = vor.u32 %v2249_v39, %v6116_v16  ;;  %v2254_v29 = vrot.slane %v6117_v5, 7  ;;  %v6126_v39 = vld [vmem:[#allocation33_spill] sm:$0xff] }
  0xed   : > { %v1187_v2 = vsel %vm5362_vm6, %v1183_v48, %v1186_v41  ;;  %v1194_v0 = vsel %vm5362_vm6, %v1188_v37, %v1193_v13  ;;  %v2258_v45 = vrot.slane %v6118_v62, 7  ;;  %v2247_v1 = vsel %vm5327_vm4, %v3641_v11, %v2246_v33  ;;  %v6124_v41 = vld [vmem:[#allocation30_spill] sm:$0xff]  ;;  %v6125_v48 = vld [vmem:[#allocation12_spill] sm:$0xff] }
  0xee   : > { %3860 = vmatprep.mubr.msk.bf16.mxu1 %vm622_vm5, %v3551_v19  ;;  %v3552_v31 = vcombine.low %v1187_v2, %v1194_v0  ;;  %v1195_v44 = vrot.slane %v4801_v28, 5  ;;  %v1196_v63 = vrot.slane %v6119_v40, 6  ;;  %v2251_v35 = vsel %vm5327_vm4, %v2248_v58, %v2250_v54  ;;  %v6129_v58 = vld [vmem:[#allocation37_spill] sm:$0xff] }
  0xef   : > { %v2255_v24 = vor.u32 %v2254_v29, %v6120_v36  ;;  %v2257_v10 = vrot.slane %v2254_v29, 4  ;;  %v2259_v32 = vor.u32 %v2258_v45, %v6121_v6  ;;  %v3649_v59 = vcombine.low %v2247_v1, %v2251_v35  ;;  %3941 = vmatmul.mubr.msk.bf16.vlgmr.msra.gmra.mrb[0].mxu0 %vm622_vm5, %v3648_v55  ;;  %v6122_v55 = vld [vmem:[#allocation18_spill] sm:$0xff] }
  0xf0   : > { %v1197_v7 = vor.u32 %v1196_v63, %v1195_v44  ;;  %v1199_v17 = vrot.slane %v4821_v47, 5  ;;  %v1200_v46 = vrot.slane %v6115_v42, 6  ;;  %v1206_v57 = vrot.slane %v5066_v27, 5  ;;  %3957 = vmatpush3.bf16.msra.mxu0 %v5265_v4  ;;  %v6128_v42 = vld [vmem:[#allocation31_spill] sm:$0xff]  ;;  %v6131_v44 = vld [vmem:[#allocation36_spill] sm:$0xff] }
  0xf1   : > { %v2256_v28 = vsel %vm5327_vm4, %v3642_v15, %v2255_v24  ;;  %v2260_v52 = vsel %vm5327_vm4, %v2257_v10, %v2259_v32  ;;  %v1207_v51 = vrot.slane %v6116_v16, 6  ;;  %3944 = vmatprep.mubr.msk.bf16.mxu0 %vm622_vm5, %v3649_v59  ;;  %v1210_v34 = vrot.slane %v6114_v49, 5  ;;  %3861 = vmatmul.mubr.msk.bf16.vlgmr.msra.gmra.mrb[0].mxu1 %vm622_vm5, %v3552_v31  ;;  %v6127_v15 = vld [vmem:[#allocation29_spill] sm:$0xff]  ;;  %v6130_v16 = vld [vmem:[#allocation26_spill] sm:$0xff]  ;;  %v6133_v10 = vld [vmem:[#allocation28_spill] sm:$0xff] }
  0xf2   : > { %v3650_v22 = vcombine.low %v2256_v28, %v2260_v52  ;;  %v1198_v47 = vrot.slane %v1197_v7, 4  ;;  %v1201_v60 = vor.u32 %v1200_v46, %v1199_v17  ;;  %v1211_v56 = vrot.slane %v6122_v55, 6  ;;  %3958 = vmatprep.subr.bf16.mxu0 %v4251_v50 }
  0xf3   : > { %v1208_v20 = vor.u32 %v1207_v51, %v1206_v57  ;;  %v1214_v25 = vrot.slane %v6117_v5, 5  ;;  %v1215_v27 = vrot.slane %v6120_v36, 6  ;;  %v1221_v9 = vrot.slane %v6118_v62, 5  ;;  %v6132_v36 = vld [vmem:[#allocation38_spill] sm:$0xff]  ;;  %v6134_v57 = vld [vmem:[#allocation35_spill] sm:$0xff] }
  0xf4   : > { %v1202_v4 = vsel %vm5362_vm6, %v1198_v47, %v1201_v60  ;;  %v1203_v21 = vrot.slane %v1201_v60, 4  ;;  %v1222_v8 = vrot.slane %v6121_v6, 6  ;;  %v1212_v61 = vor.u32 %v1211_v56, %v1210_v34  ;;  %3959 = vmatpush3.bf16.msra.mxu0 %v4251_v50 }
  0xf5   : > { %v1216_v3 = vor.u32 %v1215_v27, %v1214_v25  ;;  %v3643_v38 = vrot.slane %v6123_v30, 11  ;;  %v2263_v12 = vrot.slane %v6124_v41, 7  ;;  %v2267_v14 = vrot.slane %v6125_v48, 7 }
  0xf6   : > { %v1209_v11 = vsel %vm5362_vm6, %v1203_v21, %v1208_v20  ;;  %v1223_v43 = vor.u32 %v1222_v8, %v1221_v9  ;;  %v3644_v23 = vrot.slane %v6126_v39, 11  ;;  %v1213_v13 = vrot.slane %v1212_v61, 4  ;;  %v6135_v9 = vld [vmem:[#allocation43_spill] sm:$0xff] }
  0xf7   : > { %v3553_v37 = vcombine.low %v1202_v4, %v1209_v11  ;;  %v1218_v49 = vrot.slane %v1216_v3, 4  ;;  %v2264_v19 = vor.u32 %v2263_v12, %v6127_v15  ;;  %v2266_v2 = vrot.slane %v2263_v12, 4  ;;  %3945 = vmatmul.mubr.msk.bf16.gmra.mrb[4].mxu0 %vm622_vm5, %v3650_v22 }
  0xf8   : > { %v2268_v33 = vor.u32 %v2267_v14, %v6128_v42  ;;  %v2272_v0 = vrot.slane %v6129_v58, 7  ;;  %v2276_v54 = vrot.slane %v6130_v16, 7  ;;  %v1217_v5 = vsel %vm5362_vm6, %v1213_v13, %v1216_v3  ;;  %v6138_v13 = vld [vmem:[#allocation44_spill] sm:$0xff] }
  0xf9   : > { %3864 = vmatprep.mubr.msk.bf16.mxu1 %vm622_vm5, %v3553_v37  ;;  %v1224_v29 = vsel %vm5362_vm6, %v1218_v49, %v1223_v43  ;;  %v2265_v62 = vsel %vm5327_vm4, %v3643_v38, %v2264_v19  ;;  %v1225_v45 = vrot.slane %v6123_v30, 5  ;;  %v1226_v6 = vrot.slane %v6133_v10, 6  ;;  %v6136_v38 = vld [vmem:[#allocation24_spill] sm:$0xff]  ;;  %v6137_v43 = vld [vmem:[#allocation42_spill] sm:$0xff]  ;;  %v6139_v19 = vld [vmem:[#allocation45_spill] sm:$0xff] }
  0xfa   : > { %v3554_v31 = vcombine.low %v1217_v5, %v1224_v29  ;;  %v2269_v1 = vsel %vm5327_vm4, %v2266_v2, %v2268_v33  ;;  %v2273_v40 = vor.u32 %v2272_v0, %v6131_v44  ;;  %v2275_v63 = vrot.slane %v2272_v0, 4  ;;  %v6142_v29 = vld [vmem:[#allocation41_spill] sm:$0xff] }
  0xfb   : > { %v3651_v35 = vcombine.low %v2265_v62, %v2269_v1  ;;  %v2277_v24 = vor.u32 %v2276_v54, %v6132_v36  ;;  %v1229_v32 = vrot.slane %v6124_v41, 5  ;;  %v1230_v59 = vrot.slane %v6127_v15, 6  ;;  %v6143_v1 = vld [vmem:[#allocation47_spill] sm:$0xff] }
  0xfc   : > { %3865 = vmatmul.mubr.msk.bf16.gmra.mrb[4].mxu1 %vm622_vm5, %v3554_v31  ;;  %v2274_v50 = vsel %vm5327_vm4, %v3644_v23, %v2273_v40  ;;  %v1236_v7 = vrot.slane %v6125_v48, 5  ;;  %v1237_v17 = vrot.slane %v6128_v42, 6  ;;  %v1227_v28 = vor.u32 %v1226_v6, %v1225_v45  ;;  %v6140_v42 = vld [vmem:[#allocation48_spill] sm:$0xff] }
  0xfd   : > { %3948 = vmatprep.mubr.msk.bf16.mxu0 %vm622_vm5, %v3651_v35  ;;  %v2278_v46 = vsel %vm5327_vm4, %v2275_v63, %v2277_v24  ;;  %v1240_v52 = vrot.slane %v6126_v39, 5  ;;  %v1241_v51 = vrot.slane %v6134_v57, 6  ;;  %v1231_v47 = vor.u32 %v1230_v59, %v1229_v32  ;;  %v6144_v63 = vld [vmem:[#allocation49_spill] sm:$0xff] }
  0xfe   : > { %v3652_v22 = vcombine.low %v2274_v50, %v2278_v46  ;;  %v1238_v60 = vor.u32 %v1237_v17, %v1236_v7  ;;  %v1244_v34 = vrot.slane %v6129_v58, 5  ;;  %v1228_v20 = vrot.slane %v1227_v28, 4  ;;  %v6141_v58 = vld [vmem:[#allocation15_spill] sm:$0xff]  ;;  %v6145_v46 = vld [vmem:[#allocation46_spill] sm:$0xff] }
  0xff   : > { %v1242_v55 = vor.u32 %v1241_v51, %v1240_v52  ;;  %v1245_v56 = vrot.slane %v6131_v44, 6  ;;  %v1251_v25 = vrot.slane %v6130_v16, 5  ;;  %v1233_v27 = vrot.slane %v1231_v47, 4 }
 0x100   : > { %v1252_v4 = vrot.slane %v6132_v36, 6  ;;  %v3645_v21 = vrot.slane %v4973_v53, 11  ;;  %v2281_v8 = vrot.slane %v6135_v9, 7  ;;  %3949 = vmatmul.mubr.msk.bf16.gmra.mrb[8].mxu0 %vm622_vm5, %v3652_v22  ;;  %v1232_v61 = vsel %vm5362_vm6, %v1228_v20, %v1231_v47 }
 0x101   : > { %v1243_v3 = vrot.slane %v1242_v55, 4  ;;  %v1246_v30 = vor.u32 %v1245_v56, %v1244_v34  ;;  %v2285_v41 = vrot.slane %v6136_v38, 7  ;;  %v1239_v12 = vsel %vm5362_vm6, %v1233_v27, %v1238_v60  ;;  %v4308_v56 = vld [vmem:[%s4664_s16 + $0x4] sm:$0xf] }
 0x102   : > { %v1253_v11 = vor.u32 %v1252_v4, %v1251_v25  ;;  %v2282_v48 = vor.u32 %v2281_v8, %v6137_v43  ;;  %v2284_v14 = vrot.slane %v2281_v8, 4  ;;  %v3555_v39 = vcombine.low %v1232_v61, %v1239_v12  ;;  %v4309_v25 = vld [vmem:[%s4664_s16 + $0x8] sm:$0xf] }
 0x103   : > { %v1247_v23 = vsel %vm5362_vm6, %v1243_v3, %v1246_v30  ;;  %v1248_v37 = vrot.slane %v1246_v30, 4  ;;  %v2286_v49 = vor.u32 %v2285_v41, %v6138_v13  ;;  %v3646_v2 = vrot.slane %v6139_v19, 11  ;;  %v4311_v41 = vld [vmem:[%s4664_s16 + $0x14] sm:$0xf] }
 0x104   : > { %v2283_v15 = vsel %vm5327_vm4, %v3645_v21, %v2282_v48  ;;  %v2290_v33 = vrot.slane %v6140_v42, 7  ;;  %v2294_v0 = vrot.slane %v6141_v58, 7  ;;  %3868 = vmatprep.mubr.msk.bf16.mxu1 %vm622_vm5, %v3555_v39  ;;  %v1255_v5 = vrot.slane %v4973_v53, 5  ;;  %v4313_v48 = vld [vmem:[%s4664_s16 + $0x20] sm:$0xf] }
 0x105   : > { %v1254_v16 = vsel %vm5362_vm6, %v1248_v37, %v1253_v11  ;;  %v2287_v54 = vsel %vm5327_vm4, %v2284_v14, %v2286_v49  ;;  %v1256_v62 = vrot.slane %v6142_v29, 6  ;;  %v1259_v24 = vrot.slane %v6135_v9, 5  ;;  %v4315_v39 = vld [vmem:[%s4664_s16 + $0x2c] sm:$0xf]  ;;  %v4316_v37 = vld [vmem:[%s4664_s16 + $0x34] sm:$0xf] }
 0x106   : > { %v3556_v45 = vcombine.low %v1247_v23, %v1254_v16  ;;  %v3653_v31 = vcombine.low %v2283_v15, %v2287_v54  ;;  %v2291_v44 = vor.u32 %v2290_v33, %v6143_v1  ;;  %v2293_v40 = vrot.slane %v2290_v33, 4  ;;  %v4318_v15 = vld [vmem:[%s4664_s16 + $0x40] sm:$0xf]  ;;  %v4321_v33 = vld [vmem:[%s4664_s16 + $0x50] sm:$0xf]  ;;  %v3114_v29 = vld [vmem:[#allocation7 + $0x8] sm:$0xff] }
 0x107   : > { %v2295_v35 = vor.u32 %v2294_v0, %v6144_v63  ;;  %v1257_v36 = vor.u32 %v1256_v62, %v1255_v5  ;;  %v1260_v10 = vrot.slane %v6137_v43, 6  ;;  %v1266_v6 = vrot.slane %v6136_v38, 5  ;;  %v4310_v38 = vld [vmem:[%s4664_s16 + $0x10] sm:$0xf]  ;;  %v4312_v43 = vld [vmem:[%s4664_s16 + $0x1c] sm:$0xf] }
 0x108   : > { %3869 = vmatmul.mubr.msk.bf16.gmra.mrb[8].mxu1 %vm622_vm5, %v3556_v45  ;;  %3952 = vmatprep.mubr.msk.bf16.mxu0 %vm622_vm5, %v3653_v31  ;;  %v2292_v53 = vsel %vm5327_vm4, %v3646_v2, %v2291_v44  ;;  %v1267_v32 = vrot.slane %v6138_v13, 6  ;;  %v1270_v50 = vrot.slane %v6139_v19, 5  ;;  %v1271_v28 = vrot.slane %v6145_v46, 6  ;;  %v4317_v13 = vld [vmem:[%s4664_s16 + $0x38] sm:$0xf]  ;;  %v3113_v5 = vld [vmem:[#allocation7] sm:$0xff] }
 0x109   : > { %v2296_v59 = vsel %vm5327_vm4, %v2293_v40, %v2295_v35  ;;  %v1258_v7 = vrot.slane %v1257_v36, 4  ;;  %v1261_v17 = vor.u32 %v1260_v10, %v1259_v24  ;;  %v1274_v51 = vrot.slane %v6140_v42, 5  ;;  %v4319_v19 = vld [vmem:[%s4664_s16 + $0x44] sm:$0xf]  ;;  %v4320_v42 = vld [vmem:[%s4664_s16 + $0x4c] sm:$0xf] }
 0x10a   : > { %v3654_v52 = vcombine.low %v2292_v53, %v2296_v59  ;;  %v1268_v57 = vor.u32 %v1267_v32, %v1266_v6  ;;  %v1275_v22 = vrot.slane %v6143_v1, 6  ;;  %v1272_v34 = vor.u32 %v1271_v28, %v1270_v50  ;;  %v4322_v0 = vld [vmem:[%s4664_s16 + $0x58] sm:$0xf]  ;;  %v4323_v16 = vld [vmem:[%s4664_s16 + $0x5c] sm:$0xf]  ;;  %v3115_v31 = vld [vmem:[#allocation7 + $0x10] sm:$0xff] }
 0x10b   : > { %v1262_v47 = vsel %vm5362_vm6, %v1258_v7, %v1261_v17  ;;  %v1263_v60 = vrot.slane %v1261_v17, 4  ;;  %v1281_v18 = vrot.slane %v6141_v58, 5  ;;  %v1282_v55 = vrot.slane %v6144_v63, 6  ;;  %v3116_v1 = vld [vmem:[#allocation7 + $0x18] sm:$0xff] }
 0x10c   : > { %3953 = vmatmul.mubr.msk.bf16.gmra.mrb[12].mxu0 %vm622_vm5, %v3654_v52  ;;  %v1276_v20 = vor.u32 %v1275_v22, %v1274_v51  ;;  %v3665_v27 = vcombine.low %v4308_v56, %v4309_v25  ;;  %v1273_v21 = vrot.slane %v1272_v34, 4  ;;  %v3666_v12 = vcombine.low %v4310_v38, %v4311_v41 }
 0x10d   : > { %v1269_v4 = vsel %vm5362_vm6, %v1263_v60, %v1268_v57  ;;  %v1283_v61 = vor.u32 %v1282_v55, %v1281_v18  ;;  %v3667_v14 = vcombine.low %v4312_v43, %v4313_v48  ;;  %v3668_v23 = vcombine.low %v4314_v26, %v4315_v39  ;;  %v5557_v57 = vld [vmem:[%s5921_s2] ss:$0 sm:$0xff] }
 0x10e   : > { %v3557_v9 = vcombine.low %v1262_v47, %v1269_v4  ;;  %v1278_v8 = vrot.slane %v1276_v20, 4  ;;  %3960 = vmatprep.mubr.msk.bf16.mxu0 %vm622_vm5, %v3665_v27  ;;  %v1277_v3 = vsel %vm5362_vm6, %v1273_v21, %v1276_v20  ;;  %v3669_v49 = vcombine.low %v4316_v37, %v4317_v13 }
 0x10f   : > { %v3670_v2 = vcombine.low %v4318_v15, %v4319_v19  ;;  %v3671_v58 = vcombine.low %v4320_v42, %v4321_v33  ;;  %v3672_v54 = vcombine.low %v4322_v0, %v4323_v16  ;;  %v4010_v62 = vpack.c.bf16 %v3114_v29, %v3113_v5 }
 0x110   : > { %3872 = vmatprep.mubr.msk.bf16.mxu1 %vm622_vm5, %v3557_v9  ;;  %v1284_v30 = vsel %vm5362_vm6, %v1278_v8, %v1283_v61  ;;  %v6016_v45 = vmov 0.0|0.0   ;;  %v4013_v44 = vpack.c.bf16 %v3116_v1, %v3115_v31  ;;  %vm4458_vm7 = vmmov 0  }
 0x111   : > { %v3558_v11 = vcombine.low %v1277_v3, %v1284_v30  ;;  %4009 = vmatprep.subr.bf16.mxu1 %v6016_v45  ;;  %v6015_v40 = vmov 0.0   ;;  %vm2668_vm8 = vcmask 523520   ;;  %vm3125_vm9 = vcmask 1041409  }
 0x112   : > { %4011 = vmatpush3.bf16.msra.mxu1 %v4010_v62  ;;  %vm3127_vm10 = vcmask 1042434   ;;  %vm3129_vm12 = vcmask 1043459   ;;  %vm3133_vm13 = vcmask 1045509   ;;  %vm3135_vm14 = vcmask 1046534  }
 0x113   : > { %3873 = vmatmul.mubr.msk.bf16.gmra.mrb[12].mxu1 %vm622_vm5, %v3558_v11  ;;  %4012 = vmatprep.subr.bf16.mxu1 %v6016_v45  ;;  %vm3137_vm15 = vcmask 1047559  }
 0x114   : > { %3961 = vmatmul.mubr.msk.bf16.vlgmr.msra.gmra.mrb[0].mxu0 %vm622_vm5, %v3666_v12  ;;  %3984 = vmatprep.mubr.msk.f32.mxu1 %vm4458_vm7, %v6015_v40 }
 0x115   : > { %3964 = vmatprep.mubr.msk.bf16.mxu0 %vm622_vm5, %v3667_v14 }
 0x116   : > { %4014 = vmatpush3.bf16.msra.mxu1 %v4013_v44 }
 0x117   : > { %4015 = vmatprep.subr.bf16.mxu1 %v6016_v45 }
 0x11c   : > { %3965 = vmatmul.mubr.msk.bf16.gmra.mrb[4].mxu0 %vm622_vm5, %v3668_v23 }
 0x11d   : > { %3968 = vmatprep.mubr.msk.bf16.mxu0 %vm622_vm5, %v3669_v49 }
 0x124   : > { %3969 = vmatmul.mubr.msk.bf16.gmra.mrb[8].mxu0 %vm622_vm5, %v3670_v2 }
 0x125   : > { %3972 = vmatprep.mubr.msk.bf16.mxu0 %vm622_vm5, %v3671_v58 }
 0x12c   : > { %3973 = vmatmul.mubr.msk.bf16.gmra.mrb[12].mxu0 %vm622_vm5, %v3672_v54 }
 0x1c4   : > { %v3862_v63 = vpop.f32.mrb[0].mxu1 }
 0x1c5   : > { %v1384_v35 = vpop.f32.mrb[1].mxu1 }
 0x1c6   : > { %v3863_v36 = vpop.f32.mrb[2].mxu1 }
 0x1c7   : > { %v1387_v24 = vpop.f32.mrb[3].mxu1 }
 0x1cf   : > { %v3866_v10 = vpop.f32.mrb[4].mxu1 }
 0x1d0   : > { %v1400_v53 = vpop.f32.mrb[5].mxu1 }
 0x1d1   : > { %v3867_v6 = vpop.f32.mrb[6].mxu1 }
 0x1d2   : > { %v1403_v32 = vpop.f32.mrb[7].mxu1 }
 0x1db   : > { %v5542_v50 = vpop.f32.mrb[8].mxu1 }
 0x1dc   : > { %v5544_v59 = vpop.f32.mrb[9].mxu1 }
 0x1dd   : > { %v5546_v7 = vpop.f32.mrb[10].mxu1 }
 0x1de   : > { %v5548_v17 = vpop.f32.mrb[11].mxu1 }
 0x1e6   : > { %v5550_v46 = vpop.f32.mrb[12].mxu1 }
 0x1e7   : > { %v5552_v28 = vpop.f32.mrb[13].mxu1  ;;  %v3962_v52 = vpop.f32.mrb[0].mxu0 }
 0x1e8   : > { %v5559_v51 = vpop.f32.mrb[14].mxu1  ;;  %v4027_v22 = vadd.f32 %v3962_v52, %v3862_v63  ;;  %v2566_v47 = vpop.f32.mrb[1].mxu0 }
 0x1e9   : > { %v5561_v60 = vpop.f32.mrb[15].mxu1  ;;  %v4028_v34 = vadd.f32 %v2566_v47, %v1384_v35  ;;  %v3963_v18 = vpop.f32.mrb[2].mxu0 }
 0x1ea   : > { %v5564_v20 = vadd.f32 %v4027_v22, %v5557_v57  ;;  %v4029_v55 = vadd.f32 %v3963_v18, %v3863_v36  ;;  %v2569_v56 = vpop.f32.mrb[3].mxu0 }
 0x1eb   : > { %v5567_v25 = vadd.f32 %v4028_v34, %v5557_v57  ;;  %v4030_v27 = vadd.f32 %v2569_v56, %v1387_v24 }
 0x1ec   : > { %v5570_v4 = vadd.f32 %v4029_v55, %v5557_v57  ;;  %v2678_v21 = vsel %vm2668_vm8, %v5564_v20, -inf  ;;  %v3046_v9 = vsel %vm622_vm5, %v5564_v20, -inf }
 0x1ed   : > { %v5577_v8 = vadd.f32 %v4030_v27, %v5557_v57  ;;  %v2669_v61 = vsel %vm2668_vm8, %v5567_v25, -inf  ;;  %v3037_v3 = vsel %vm622_vm5, %v5567_v25, -inf }
 0x1ee   : > { %v2679_v30 = vsel %vm2668_vm8, %v5570_v4, -inf  ;;  %v3047_v38 = vsel %vm622_vm5, %v5570_v4, -inf }
 0x1ef   : > { %v2680_v41 = vmax.f32 %v2678_v21, %v2679_v30  ;;  %v3048_v12 = vmax.f32 %v3046_v9, %v3047_v38  ;;  %v2670_v11 = vsel %vm2668_vm8, %v5577_v8, -inf  ;;  %v3038_v43 = vsel %vm622_vm5, %v5577_v8, -inf  ;;  %v3966_v48 = vpop.f32.mrb[4].mxu0 }
 0x1f0   : > { %v2671_v14 = vmax.f32 %v2669_v61, %v2670_v11  ;;  %v3039_v26 = vmax.f32 %v3037_v3, %v3038_v43  ;;  %v4031_v39 = vadd.f32 %v3966_v48, %v3866_v10  ;;  %v2582_v23 = vpop.f32.mrb[5].mxu0 }
 0x1f1   : > { %v2681_v37 = vrot.slane %v2680_v41, 4  ;;  %v3049_v13 = vrot.slane %v3048_v12, 4  ;;  %v4032_v49 = vadd.f32 %v2582_v23, %v1400_v53  ;;  %v3967_v15 = vpop.f32.mrb[6].mxu0 }
 0x1f2   : > { %v2672_v19 = vrot.slane %v2671_v14, 4  ;;  %v3040_v2 = vrot.slane %v3039_v26, 4  ;;  %v4033_v42 = vadd.f32 %v3967_v15, %v3867_v6  ;;  %v2585_v33 = vpop.f32.mrb[7].mxu0  ;;  %v5592_v16 = vadd.f32 %v4031_v39, %v5557_v57 }
 0x1f3   : > { %v2682_v58 = vmax.f32 %v2680_v41, %v2681_v37  ;;  %v3050_v0 = vmax.f32 %v3048_v12, %v3049_v13  ;;  %v4034_v54 = vadd.f32 %v2585_v33, %v1403_v32  ;;  %v5595_v1 = vadd.f32 %v4032_v49, %v5557_v57 }
 0x1f4   : > { %v2673_v5 = vmax.f32 %v2671_v14, %v2672_v19  ;;  %v3041_v29 = vmax.f32 %v3039_v26, %v3040_v2  ;;  %v5598_v35 = vadd.f32 %v4033_v42, %v5557_v57  ;;  %v2696_v53 = vsel %vm2668_vm8, %v5592_v16, -inf }
 0x1f5   : > { %v2683_v62 = vrot.slane %v2682_v58, 2  ;;  %v3051_v31 = vrot.slane %v3050_v0, 2  ;;  %v5601_v36 = vadd.f32 %v4034_v54, %v5557_v57  ;;  %v3064_v6 = vsel %vm622_vm5, %v5592_v16, -inf }
 0x1f6   : > { %v2674_v44 = vrot.slane %v2673_v5, 2  ;;  %v3042_v63 = vrot.slane %v3041_v29, 2  ;;  %v2697_v47 = vsel %vm2668_vm8, %v5598_v35, -inf  ;;  %v3065_v34 = vsel %vm622_vm5, %v5598_v35, -inf }
 0x1f7   : > { %v2684_v24 = vmax.f32 %v2682_v58, %v2683_v62  ;;  %v3052_v10 = vmax.f32 %v3050_v0, %v3051_v31  ;;  %v3970_v32 = vpop.f32.mrb[8].mxu0  ;;  %v2687_v56 = vsel %vm2668_vm8, %v5595_v1, -inf  ;;  %v2698_v27 = vmax.f32 %v2696_v53, %v2697_v47 }
 0x1f8   : > { %v2675_v52 = vmax.f32 %v2673_v5, %v2674_v44  ;;  %v3043_v22 = vmax.f32 %v3041_v29, %v3042_v63  ;;  %v2598_v18 = vpop.f32.mrb[9].mxu0  ;;  %v3066_v21 = vmax.f32 %v3064_v6, %v3065_v34  ;;  %v3055_v3 = vsel %vm622_vm5, %v5595_v1, -inf }
 0x1f9   : > { %v2685_v55 = vrot.slane %v2684_v24, 1  ;;  %v3971_v9 = vpop.f32.mrb[10].mxu0  ;;  %v2688_v30 = vsel %vm2668_vm8, %v5601_v36, -inf  ;;  %v3056_v38 = vsel %vm622_vm5, %v5601_v36, -inf  ;;  %v3053_v11 = vrot.slane %v3052_v10, 1 }
 0x1fa   : > { %v2676_v61 = vrot.slane %v2675_v52, 1  ;;  %v2601_v41 = vpop.f32.mrb[11].mxu0  ;;  %v2699_v43 = vrot.slane %v2698_v27, 4  ;;  %v3067_v48 = vrot.slane %v3066_v21, 4  ;;  %v3044_v26 = vrot.slane %v3043_v22, 1 }
 0x1fb   : > { %v5619_v12 = vmax.f32 %v2684_v24, %v2685_v55  ;;  %v2689_v39 = vmax.f32 %v2687_v56, %v2688_v30  ;;  %v3057_v23 = vmax.f32 %v3055_v3, %v3056_v38  ;;  %v4035_v15 = vadd.f32 %v3970_v32, %v5542_v50 }
 0x1fc   : > { %v5621_v14 = vmax.f32 %v2675_v52, %v2676_v61  ;;  %v2700_v13 = vmax.f32 %v2698_v27, %v2699_v43  ;;  %v3068_v49 = vmax.f32 %v3066_v21, %v3067_v48  ;;  %v4036_v33 = vadd.f32 %v2598_v18, %v5544_v59 }
 0x1fd   : > { %v2744_v37 = vsub.f32 %v5570_v4, %v5619_v12  ;;  %v2690_v2 = vrot.slane %v2689_v39, 4  ;;  %v3058_v42 = vrot.slane %v3057_v23, 4  ;;  %v5630_v5 = vadd.f32 %v4035_v15, %v5557_v57 }
 0x1fe   : > { %v2742_v19 = vsub.f32 %v5577_v8, %v5621_v14  ;;  %v2701_v0 = vrot.slane %v2700_v13, 2  ;;  %v3069_v54 = vrot.slane %v3068_v49, 2  ;;  %v5632_v63 = vmax.f32 %v3052_v10, %v3053_v11 }
 0x1ff   : > { %v2763_v58 = vmul.f32 1.442695, %v2744_v37  ;;  %v3974_v29 = vpop.f32.mrb[12].mxu0  ;;  %v2691_v62 = vmax.f32 %v2689_v39, %v2690_v2  ;;  %v3059_v31 = vmax.f32 %v3057_v23, %v3058_v42  ;;  %v5634_v50 = vmax.f32 %v3043_v22, %v3044_v26 }
 0x200   : > { %v2614_v44 = vpop.f32.mrb[13].mxu0  ;;  %v2702_v24 = vmax.f32 %v2700_v13, %v2701_v0  ;;  %v3070_v53 = vmax.f32 %v3068_v49, %v3069_v54  ;;  %v5638_v32 = vmul.f32 1.442695, %v2742_v19  ;;  %v5641_v47 = vadd.f32 %v4036_v33, %v5557_v57 }
 0x201   : > { %v5636_v6 = vpop.f32.mrb[14].mxu0  ;;  %v2692_v59 = vrot.slane %v2691_v62, 2  ;;  %v3060_v52 = vrot.slane %v3059_v31, 2  ;;  %4260 = vpow2.f32 %v2763_v58  ;;  %v2714_v10 = vsel %vm2668_vm8, %v5630_v5, -inf }
 0x202   : > { %v2617_v34 = vpop.f32.mrb[15].mxu0  ;;  %v2703_v18 = vrot.slane %v2702_v24, 1  ;;  %v3082_v22 = vsel %vm622_vm5, %v5630_v5, -inf  ;;  %v4037_v27 = vadd.f32 %v3971_v9, %v5546_v7  ;;  %v4038_v21 = vadd.f32 %v2601_v41, %v5548_v17 }
 0x203   : > { %v2693_v55 = vmax.f32 %v2691_v62, %v2692_v59  ;;  %v3061_v56 = vmax.f32 %v3059_v31, %v3060_v52  ;;  %v3071_v3 = vrot.slane %v3070_v53, 1  ;;  %v4039_v30 = vadd.f32 %v3974_v29, %v5550_v46 }
 0x204   : > { %v2704_v61 = vmax.f32 %v2702_v24, %v2703_v18  ;;  %v4040_v38 = vadd.f32 %v2614_v44, %v5552_v28  ;;  %v2705_v43 = vsel %vm2668_vm8, %v5641_v47, -inf  ;;  %v5654_v48 = vadd.f32 %v4037_v27, %v5557_v57 }
 0x205   : > { %v2694_v11 = vrot.slane %v2693_v55, 1  ;;  %v5657_v26 = vadd.f32 %v4038_v21, %v5557_v57  ;;  %v3062_v9 = vrot.slane %v3061_v56, 1  ;;  %v3073_v46 = vsel %vm622_vm5, %v5641_v47, -inf }
 0x206   : > { %v2747_v7 = vsub.f32 %v5592_v16, %v2704_v61  ;;  %v2748_v17 = vsub.f32 %v5598_v35, %v2704_v61  ;;  %v2715_v28 = vsel %vm2668_vm8, %v5654_v48, -inf  ;;  %v3083_v39 = vsel %vm622_vm5, %v5654_v48, -inf }
 0x207   : > { %v2695_v41 = vmax.f32 %v2693_v55, %v2694_v11  ;;  %v5668_v23 = vadd.f32 %v4039_v30, %v5557_v57  ;;  %v2716_v49 = vmax.f32 %v2714_v10, %v2715_v28  ;;  %v3084_v15 = vmax.f32 %v3082_v22, %v3083_v39 }
 0x208   : > { %v2769_v37 = vmul.f32 1.442695, %v2747_v7  ;;  %v2771_v13 = vmul.f32 1.442695, %v2748_v17  ;;  %v2706_v42 = vsel %vm2668_vm8, %v5657_v26, -inf  ;;  %v3074_v33 = vsel %vm622_vm5, %v5657_v26, -inf }
 0x209   : > { %v2745_v19 = vsub.f32 %v5595_v1, %v2695_v41  ;;  %v2746_v2 = vsub.f32 %v5601_v36, %v2695_v41  ;;  %v5676_v58 = vmax.f32 %v3070_v53, %v3071_v3  ;;  %v2717_v0 = vrot.slane %v2716_v49, 4 }
 0x20a   : > { %v3085_v54 = vrot.slane %v3084_v15, 4  ;;  %v2707_v29 = vmax.f32 %v2705_v43, %v2706_v42  ;;  %4262 = vpow2.f32 %v2769_v37  ;;  %v3075_v31 = vmax.f32 %v3073_v46, %v3074_v33 }
 0x20b   : > { %v2765_v62 = vmul.f32 1.442695, %v2745_v19  ;;  %v5679_v44 = vadd.f32 %v4040_v38, %v5557_v57  ;;  %v5681_v24 = vpop.eup %4260  ;;  %v2767_v59 = vmul.f32 1.442695, %v2746_v2  ;;  %v2718_v52 = vmax.f32 %v2716_v49, %v2717_v0 }
 0x20c   : > { %v3086_v18 = vmax.f32 %v3084_v15, %v3085_v54  ;;  %v2708_v10 = vrot.slane %v2707_v29, 4  ;;  %4264 = vpow2.f32 %v2771_v13  ;;  %v3063_v22 = vmax.f32 %v3061_v56, %v3062_v9 }
 0x20d   : > { %v3076_v53 = vrot.slane %v3075_v31, 4  ;;  %v2732_v55 = vsel %vm2668_vm8, %v5668_v23, -inf  ;;  %4266 = vpow2.f32 %v2765_v62  ;;  %v2719_v27 = vrot.slane %v2718_v52, 2 }
 0x20e   : > { %v3087_v21 = vrot.slane %v3086_v18, 2  ;;  %v2709_v61 = vmax.f32 %v2707_v29, %v2708_v10  ;;  %v3100_v30 = vsel %vm622_vm5, %v5668_v23, -inf  ;;  %v4041_v38 = vadd.f32 %v5636_v6, %v5559_v51 }
 0x20f   : > { %v3077_v3 = vmax.f32 %v3075_v31, %v3076_v53  ;;  %v4042_v11 = vadd.f32 %v2617_v34, %v5561_v60  ;;  %4268 = vpow2.f32 %v2767_v59  ;;  %v2720_v43 = vmax.f32 %v2718_v52, %v2719_v27 }
 0x210   : > { %v2710_v56 = vrot.slane %v2709_v61, 2  ;;  %v2723_v7 = vsel %vm2668_vm8, %v5679_v44, -inf  ;;  %v3091_v9 = vsel %vm622_vm5, %v5679_v44, -inf  ;;  %v5695_v46 = vadd.f32 %v4041_v38, %v5557_v57 }
 0x211   : > { %v3078_v17 = vrot.slane %v3077_v3, 2  ;;  %v5698_v41 = vadd.f32 %v4042_v11, %v5557_v57  ;;  %v2721_v51 = vrot.slane %v2720_v43, 1  ;;  %v3088_v6 = vmax.f32 %v3086_v18, %v3087_v21 }
 0x212   : > { %v2711_v60 = vmax.f32 %v2709_v61, %v2710_v56  ;;  %v3126_v34 = vsel %vm3125_vm9, %v5632_v63, %v5634_v50  ;;  %v2733_v39 = vsel %vm2668_vm8, %v5695_v46, -inf  ;;  %v3101_v37 = vsel %vm622_vm5, %v5695_v46, -inf }
 0x213   : > { %v3079_v28 = vmax.f32 %v3077_v3, %v3078_v17  ;;  %v2724_v13 = vsel %vm2668_vm8, %v5698_v41, -inf  ;;  %v2722_v57 = vmax.f32 %v2720_v43, %v2721_v51  ;;  %v2734_v15 = vmax.f32 %v2732_v55, %v2733_v39 }
 0x214   : > { %v2712_v49 = vrot.slane %v2711_v60, 1  ;;  %v3102_v19 = vmax.f32 %v3100_v30, %v3101_v37  ;;  %v5709_v2 = vpop.eup %4262  ;;  %v2725_v33 = vmax.f32 %v2723_v7, %v2724_v13  ;;  %v3092_v63 = vsel %vm622_vm5, %v5698_v41, -inf }
 0x215   : > { %v3080_v42 = vrot.slane %v3079_v28, 1  ;;  %v3128_v50 = vsel %vm3127_vm10, %v3063_v22, %v3126_v34  ;;  %v2751_v0 = vsub.f32 %v5630_v5, %v2722_v57  ;;  %v2752_v54 = vsub.f32 %v5654_v48, %v2722_v57 }
 0x216   : > { %v2713_v29 = vmax.f32 %v2711_v60, %v2712_v49  ;;  %v2735_v62 = vrot.slane %v2734_v15, 4  ;;  %v5716_v31 = vpop.eup %4264  ;;  %v3089_v59 = vrot.slane %v3088_v6, 1  ;;  %v3103_v52 = vrot.slane %v3102_v19, 4 }
 0x217   : > { %v2726_v18 = vrot.slane %v2725_v33, 4  ;;  %v3093_v10 = vmax.f32 %v3091_v9, %v3092_v63  ;;  %v5718_v53 = vpop.eup %4266  ;;  %v2777_v55 = vmul.f32 1.442695, %v2751_v0  ;;  %v2779_v27 = vmul.f32 1.442695, %v2752_v54 }
 0x218   : > { %v2749_v21 = vsub.f32 %v5641_v47, %v2713_v29  ;;  %v2750_v22 = vsub.f32 %v5657_v26, %v2713_v29  ;;  %v2736_v61 = vmax.f32 %v2734_v15, %v2735_v62  ;;  %v3104_v3 = vmax.f32 %v3102_v19, %v3103_v52 }
 0x219   : > { %v2727_v30 = vmax.f32 %v2725_v33, %v2726_v18  ;;  %v3094_v38 = vrot.slane %v3093_v10, 4  ;;  %v5722_v11 = vpop.eup %4268  ;;  %4270 = vpow2.f32 %v2777_v55  ;;  %v3081_v7 = vmax.f32 %v3079_v28, %v3080_v42 }
 0x21a   : > { %v2773_v43 = vmul.f32 1.442695, %v2749_v21  ;;  %v2775_v56 = vmul.f32 1.442695, %v2750_v22  ;;  %4272 = vpow2.f32 %v2779_v27  ;;  %v2737_v17 = vrot.slane %v2736_v61, 2 }
 0x21b   : > { %v3105_v9 = vrot.slane %v3104_v3, 2  ;;  %v2728_v51 = vrot.slane %v2727_v30, 2  ;;  %4274 = vpow2.f32 %v5638_v32  ;;  %v3095_v60 = vmax.f32 %v3093_v10, %v3094_v38 }
 0x21c   : > { %v3130_v34 = vsel %vm3129_vm12, %v5676_v58, %v3128_v50  ;;  %v2743_v39 = vsub.f32 %v5564_v20, %v5619_v12  ;;  %v2738_v37 = vmax.f32 %v2736_v61, %v2737_v17  ;;  %v3090_v57 = vmax.f32 %v3088_v6, %v3089_v59 }
 0x21d   : > { %v2729_v13 = vmax.f32 %v2727_v30, %v2728_v51  ;;  %v3106_v49 = vmax.f32 %v3104_v3, %v3105_v9  ;;  %4276 = vpow2.f32 %v2773_v43  ;;  %v3096_v28 = vrot.slane %v3095_v60, 2 }
 0x21e   : > { %v2761_v15 = vmul.f32 1.442695, %v2743_v39  ;;  %v2741_v19 = vsub.f32 %v5567_v25, %v5621_v14  ;;  %4278 = vpow2.f32 %v2775_v56  ;;  %v2739_v32 = vrot.slane %v2738_v37, 1 }
 0x21f   : > { %v2730_v42 = vrot.slane %v2729_v13, 1  ;;  %v3132_v33 = vsel %vm1986_vm11, %v3081_v7, %v3130_v34  ;;  %v3097_v58 = vmax.f32 %v3095_v60, %v3096_v28  ;;  %v2816_v12 = vsel %vm2668_vm8, %v5709_v2, 0.0 }
 0x220   : > { %4280 = vpow2.f32 %v2761_v15  ;;  %v2757_v63 = vmul.f32 1.442695, %v2741_v19  ;;  %v2740_v50 = vmax.f32 %v2738_v37, %v2739_v32  ;;  %v3107_v0 = vrot.slane %v3106_v49, 1 }
 0x221   : > { %v2731_v6 = vmax.f32 %v2729_v13, %v2730_v42  ;;  %v2817_v54 = vsel %vm2668_vm8, %v5716_v31, 0.0  ;;  %v3098_v29 = vrot.slane %v3097_v58, 1  ;;  %v2807_v62 = vsel %vm2668_vm8, %v5718_v53, 0.0 }
 0x222   : > { %4282 = vpow2.f32 %v2757_v63  ;;  %v2818_v14 = vadd.f32 %v2817_v54, %v2816_v12  ;;  %v2755_v59 = vsub.f32 %v5668_v23, %v2740_v50  ;;  %v2756_v52 = vsub.f32 %v5695_v46, %v2740_v50 }
 0x223   : > { %v2753_v18 = vsub.f32 %v5679_v44, %v2731_v6  ;;  %v2754_v10 = vsub.f32 %v5698_v41, %v2731_v6  ;;  %v5742_v55 = vpop.eup %4270  ;;  %v3099_v27 = vmax.f32 %v3097_v58, %v3098_v29  ;;  %v3134_v21 = vsel %vm3133_vm13, %v3090_v57, %v3132_v33 }
 0x224   : > { %v2819_v22 = vrot.slane %v2818_v14, 4  ;;  %v2808_v61 = vsel %vm2668_vm8, %v5722_v11, 0.0  ;;  %v5747_v3 = vpop.eup %4272  ;;  %v2785_v30 = vmul.f32 1.442695, %v2755_v59  ;;  %v2787_v38 = vmul.f32 1.442695, %v2756_v52 }
 0x225   : > { %v2781_v43 = vmul.f32 1.442695, %v2753_v18  ;;  %v3108_v56 = vmax.f32 %v3106_v49, %v3107_v0  ;;  %v5749_v7 = vpop.eup %4274  ;;  %v2783_v17 = vmul.f32 1.442695, %v2754_v10  ;;  %v3136_v9 = vsel %vm3135_vm14, %v3099_v27, %v3134_v21 }
 0x226   : > { %v2809_v51 = vadd.f32 %v2808_v61, %v2807_v62  ;;  %4284 = vpow2.f32 %v2785_v30  ;;  %v2834_v34 = vsel %vm2668_vm8, %v5742_v55, 0.0  ;;  %v2835_v39 = vsel %vm2668_vm8, %v5747_v3, 0.0 }
 0x227   : > { %v3138_v60 = vsel %vm3137_vm15, %v3108_v56, %v3136_v9  ;;  %v5757_v37 = vpop.eup %4276  ;;  %4286 = vpow2.f32 %v2787_v38  ;;  %v2799_v57 = vsel %vm2668_vm8, %v5681_v24, 0.0  ;;  %v2820_v49 = vadd.f32 %v2819_v22, %v2818_v14 }
 0x228   : > { %3985 = vmatmul.mubr.msk.f32.vlgmr.msra.gmra.mrb[16].mxu1 %vm622_vm5, %v3138_v60  ;;  %v5760_v13 = vpop.eup %4278  ;;  %4288 = vpow2.f32 %v2781_v43  ;;  %v2836_v15 = vadd.f32 %v2835_v39, %v2834_v34  ;;  %v2790_v32 = vsel %vm2668_vm8, %v5749_v7, 0.0  ;;  %v2810_v42 = vrot.slane %v2809_v51, 4 }
 0x229   : > { %3995 = vmatprep.mubr.msk.f32.mxu1 %vm4458_vm7, %v6015_v40  ;;  %4290 = vpow2.f32 %v2783_v17  ;;  %v2825_v63 = vsel %vm2668_vm8, %v5757_v37, 0.0  ;;  %v2826_v12 = vsel %vm2668_vm8, %v5760_v13, 0.0  ;;  %v2821_v6 = vrot.slane %v2820_v49, 2 }
 0x22a   : > { %v5766_v28 = vpop.eup %4280  ;;  %v2837_v29 = vrot.slane %v2836_v15, 4  ;;  %v2811_v14 = vadd.f32 %v2810_v42, %v2809_v51  ;;  %v2827_v62 = vadd.f32 %v2826_v12, %v2825_v63 }
 0x22b   : > { %v2798_v19 = vsel %vm2668_vm8, %v5766_v28, 0.0  ;;  %v2822_v10 = vadd.f32 %v2821_v6, %v2820_v49 }
 0x22c   : > { %v5772_v33 = vpop.eup %4282  ;;  %v2800_v58 = vadd.f32 %v2799_v57, %v2798_v19  ;;  %v2838_v61 = vadd.f32 %v2837_v29, %v2836_v15  ;;  %v2812_v38 = vrot.slane %v2811_v14, 2  ;;  %v2828_v43 = vrot.slane %v2827_v62, 4 }
 0x22d   : > { %v2789_v50 = vsel %vm2668_vm8, %v5772_v33, 0.0  ;;  %v2823_v60 = vrot.slane %v2822_v10, 1 }
 0x22e   : > { %v2801_v0 = vrot.slane %v2800_v58, 4  ;;  %v2791_v54 = vadd.f32 %v2790_v32, %v2789_v50  ;;  %v2839_v19 = vrot.slane %v2838_v61, 2  ;;  %v2813_v42 = vadd.f32 %v2812_v38, %v2811_v14 }
 0x230   : > { %v2802_v59 = vadd.f32 %v2801_v0, %v2800_v58  ;;  %v2792_v52 = vrot.slane %v2791_v54, 4  ;;  %v5780_v18 = vpop.eup %4284  ;;  %v2829_v58 = vadd.f32 %v2828_v43, %v2827_v62  ;;  %v2824_v0 = vadd.f32 %v2823_v60, %v2822_v10 }
 0x231   : > { %v5782_v27 = vpop.eup %4286  ;;  %v2852_v39 = vsel %vm2668_vm8, %v5780_v18, 0.0  ;;  %v2840_v29 = vadd.f32 %v2839_v19, %v2838_v61 }
 0x232   : > { %v2803_v21 = vrot.slane %v2802_v59, 2  ;;  %v2793_v22 = vadd.f32 %v2792_v52, %v2791_v54  ;;  %v5784_v30 = vpop.eup %4288  ;;  %v2853_v57 = vsel %vm2668_vm8, %v5782_v27, 0.0  ;;  %v2814_v52 = vrot.slane %v2813_v42, 1 }
 0x233   : > { %v5786_v56 = vpop.eup %4290  ;;  %v2843_v51 = vsel %vm2668_vm8, %v5784_v30, 0.0  ;;  %v2854_v6 = vadd.f32 %v2853_v57, %v2852_v39  ;;  %v2841_v45 = vrot.slane %v2840_v29, 1 }
 0x234   : > { %v2804_v17 = vadd.f32 %v2803_v21, %v2802_v59  ;;  %v2794_v9 = vrot.slane %v2793_v22, 2  ;;  %v2844_v34 = vsel %vm2668_vm8, %v5786_v56, 0.0  ;;  %v2830_v21 = vrot.slane %v2829_v58, 2 }
 0x235   : > { %v2845_v32 = vadd.f32 %v2844_v34, %v2843_v51  ;;  %v2855_v40 = vrot.slane %v2854_v6, 4  ;;  %v2842_v62 = vadd.f32 %v2841_v45, %v2840_v29  ;;  %v3111_v29 = vld [vmem:[%s5922_s3 + $0x10] sm:$0xff] }
 0x236   : > { %v2805_v49 = vrot.slane %v2804_v17, 1  ;;  %v2795_v15 = vadd.f32 %v2794_v9, %v2793_v22  ;;  %v2815_v9 = vadd.f32 %v2814_v52, %v2813_v42  ;;  %v2831_v51 = vadd.f32 %v2830_v21, %v2829_v58 }
 0x237   : > { %v2846_v50 = vrot.slane %v2845_v32, 4  ;;  %v2856_v14 = vadd.f32 %v2855_v40, %v2854_v6 }
 0x238   : > { %v2806_v63 = vadd.f32 %v2805_v49, %v2804_v17  ;;  %v2796_v12 = vrot.slane %v2795_v15, 1  ;;  %v2832_v17 = vrot.slane %v2831_v51, 1 }
 0x239   : > { %v2847_v59 = vadd.f32 %v2846_v50, %v2845_v32  ;;  %v2857_v10 = vrot.slane %v2856_v14, 2 }
 0x23a   : > { %4292 = vrcp.f32 %v2806_v63  ;;  %v2797_v54 = vadd.f32 %v2796_v12, %v2795_v15  ;;  %v2833_v49 = vadd.f32 %v2832_v17, %v2831_v51 }
 0x23b   : > { %v2848_v22 = vrot.slane %v2847_v59, 2  ;;  %v2858_v15 = vadd.f32 %v2857_v10, %v2856_v14 }
 0x23c   : > { %4294 = vrcp.f32 %v2797_v54  ;;  %v6146_v54 = vmov 0.0|0.0  }
 0x23d   : > { %4296 = vrcp.f32 %v2824_v0  ;;  %v2849_v38 = vadd.f32 %v2848_v22, %v2847_v59  ;;  %v2859_v32 = vrot.slane %v2858_v15, 1  ;;  %v3112_v59 = vld [vmem:[%s5922_s3 + $0x18] sm:$0xff] }
 0x23e   : > { %4298 = vrcp.f32 %v2815_v9  ;;  %v4019_v52 = vpack.c.bf16 %v3112_v59, %v3111_v29 }
 0x23f   : > { %4300 = vrcp.f32 %v2842_v62  ;;  %v2850_v34 = vrot.slane %v2849_v38, 1  ;;  %v2860_v63 = vadd.f32 %v2859_v32, %v2858_v15 }
 0x240   : > { %4302 = vrcp.f32 %v2833_v49 }
 0x241   : > { %v2851_v40 = vadd.f32 %v2850_v34, %v2849_v38 }
 0x243   : > { %4304 = vrcp.f32 %v2851_v40 }
 0x244   : > { %v4293_v43 = vpop.eup %4292  ;;  %4306 = vrcp.f32 %v2860_v63 }
 0x245   : > { %v2871_v60 = vmul.f32 %v4293_v43, %v5766_v28  ;;  %v2872_v45 = vmul.f32 %v4293_v43, %v5681_v24 }
 0x246   : > { %v4295_v61 = vpop.eup %4294 }
 0x247   : > { %2905 = vrot.lane.b32.xlu1 %v2871_v60, %s4460_s26  ;;  %v2869_v39 = vmul.f32 %v4295_v61, %v5772_v33  ;;  %v4297_v57 = vpop.eup %4296  ;;  %v2870_v28 = vmul.f32 %v4295_v61, %v5749_v7 }
 0x248   : > { %v2876_v19 = vmul.f32 %v4297_v57, %v5716_v31  ;;  %v2875_v33 = vmul.f32 %v4297_v57, %v5709_v2  ;;  %v4299_v42 = vpop.eup %4298 }
 0x249   : > { %2901 = vrot.lane.b32.xlu0 %v2869_v39, %s4460_s26  ;;  %v4301_v58 = vpop.eup %4300  ;;  %v2874_v24 = vmul.f32 %v4299_v42, %v5722_v11  ;;  %v2873_v31 = vmul.f32 %v4299_v42, %v5718_v53 }
 0x24a   : > { %v2880_v7 = vmul.f32 %v4301_v58, %v5747_v3  ;;  %v2879_v2 = vmul.f32 %v4301_v58, %v5742_v55  ;;  %v4303_v12 = vpop.eup %4302  ;;  %v3109_v55 = vld [vmem:[%s5922_s3] sm:$0xff] }
 0x24b   : > { %2907 = vrot.lane.b32.xlu1 %v2872_v45, %s4460_s26  ;;  %v2878_v6 = vmul.f32 %v4303_v12, %v5760_v13  ;;  %v2877_v11 = vmul.f32 %v4303_v12, %v5757_v37  ;;  %v3110_v13 = vld [vmem:[%s5922_s3 + $0x8] sm:$0xff] }
 0x24d   : > { %2903 = vrot.lane.b32.xlu0 %v2870_v28, %s4460_s26  ;;  %v4305_v50 = vpop.eup %4304 }
 0x24e   : > { %v2882_v53 = vmul.f32 %v4305_v50, %v5786_v56  ;;  %v2881_v3 = vmul.f32 %v4305_v50, %v5784_v30  ;;  %v4307_v0 = vpop.eup %4306  ;;  %v4016_v56 = vpack.c.bf16 %v3110_v13, %v3109_v55 }
 0x24f   : > { %2915 = vrot.lane.b32.xlu1 %v2876_v19, %s4460_s26  ;;  %v2884_v37 = vmul.f32 %v4307_v0, %v5782_v27  ;;  %v2883_v30 = vmul.f32 %v4307_v0, %v5780_v18 }
 0x250   : > { %4017 = vmatpush3.bf16.msra.mxu1 %v4016_v56 }
 0x251   : > { %2913 = vrot.lane.b32.xlu0 %v2875_v33, %s4460_s26  ;;  %4018 = vmatprep.subr.bf16.mxu1 %v6146_v54 }
 0x253   : > { %2911 = vrot.lane.b32.xlu1 %v2874_v24, %s4460_s26 }
 0x254   : > { %4020 = vmatpush3.bf16.msra.mxu1 %v4019_v52 }
 0x255   : > { %2909 = vrot.lane.b32.xlu0 %v2873_v31, %s4460_s26  ;;  %4021 = vmatprep.subr.bf16.mxu1 %v6146_v54 }
 0x257   : > { %2923 = vrot.lane.b32.xlu1 %v2880_v7, %s4460_s26 }
 0x259   : > { %2921 = vrot.lane.b32.xlu0 %v2879_v2, %s4460_s26 }
 0x25b   : > { %2919 = vrot.lane.b32.xlu1 %v2878_v6, %s4460_s26 }
 0x25d   : > { %2917 = vrot.lane.b32.xlu0 %v2877_v11, %s4460_s26 }
 0x25f   : > { %2927 = vrot.lane.b32.xlu1 %v2882_v53, %s4460_s26 }
 0x261   : > { %2925 = vrot.lane.b32.xlu0 %v2881_v3, %s4460_s26 }
 0x263   : > { %2931 = vrot.lane.b32.xlu1 %v2884_v37, %s4460_s26 }
 0x265   : > { %2929 = vrot.lane.b32.xlu0 %v2883_v30, %s4460_s26 }
 0x2b9   : > { %v2906_v27 = vpop.permute.xlu1 %2905 }
 0x2ba   : > { %v2951_v18 = vmul.f32 %v2906_v27, %v5564_v20 }
 0x2bb   : > { %v2902_v21 = vpop.permute.xlu0 %2901 }
 0x2bc   : > { %v2949_v9 = vmul.f32 %v2902_v21, %v5567_v25  ;;  %v2974_v43 = vsel %vm622_vm5, %v2951_v18, 0.0 }
 0x2bd   : > { %v2908_v22 = vpop.permute.xlu1 %2907 }
 0x2be   : > { %v2952_v51 = vmul.f32 %v2908_v22, %v5570_v4  ;;  %v2965_v10 = vsel %vm622_vm5, %v2949_v9, 0.0 }
 0x2bf   : > { %v2904_v14 = vpop.permute.xlu0 %2903 }
 0x2c0   : > { %v2975_v62 = vsel %vm622_vm5, %v2952_v51, 0.0  ;;  %v2950_v38 = vmul.f32 %v2904_v14, %v5577_v8 }
 0x2c1   : > { %v2916_v17 = vpop.permute.xlu1 %2915  ;;  %v2976_v60 = vadd.f32 %v2975_v62, %v2974_v43 }
 0x2c2   : > { %v2966_v61 = vsel %vm622_vm5, %v2950_v38, 0.0  ;;  %v2956_v20 = vmul.f32 %v2916_v17, %v5598_v35 }
 0x2c3   : > { %v2967_v34 = vadd.f32 %v2966_v61, %v2965_v10  ;;  %v2914_v39 = vpop.permute.xlu0 %2913  ;;  %v2977_v49 = vrot.slane %v2976_v60, 4 }
 0x2c4   : > { %v2955_v25 = vmul.f32 %v2914_v39, %v5592_v16  ;;  %v2993_v4 = vsel %vm622_vm5, %v2956_v20, 0.0 }
 0x2c5   : > { %v2912_v57 = vpop.permute.xlu1 %2911  ;;  %v2968_v45 = vrot.slane %v2967_v34, 4  ;;  %v2978_v33 = vadd.f32 %v2977_v49, %v2976_v60 }
 0x2c6   : > { %v2992_v8 = vsel %vm622_vm5, %v2955_v25, 0.0  ;;  %v2954_v15 = vmul.f32 %v2912_v57, %v5601_v36 }
 0x2c7   : > { %v2910_v40 = vpop.permute.xlu0 %2909  ;;  %v2994_v28 = vadd.f32 %v2993_v4, %v2992_v8  ;;  %v2969_v58 = vadd.f32 %v2968_v45, %v2967_v34  ;;  %v2979_v50 = vrot.slane %v2978_v33, 2 }
 0x2c8   : > { %v2984_v19 = vsel %vm622_vm5, %v2954_v15, 0.0  ;;  %v2953_v32 = vmul.f32 %v2910_v40, %v5595_v1 }
 0x2c9   : > { %v2924_v35 = vpop.permute.xlu1 %2923  ;;  %v2995_v31 = vrot.slane %v2994_v28, 4  ;;  %v2970_v11 = vrot.slane %v2969_v58, 2 }
 0x2ca   : > { %v2983_v42 = vsel %vm622_vm5, %v2953_v32, 0.0  ;;  %v2960_v16 = vmul.f32 %v2924_v35, %v5654_v48 }
 0x2cb   : > { %v2985_v63 = vadd.f32 %v2984_v19, %v2983_v42  ;;  %v2922_v24 = vpop.permute.xlu0 %2921  ;;  %v2996_v48 = vadd.f32 %v2995_v31, %v2994_v28  ;;  %v2971_v52 = vadd.f32 %v2970_v11, %v2969_v58 }
 0x2cc   : > { %v3011_v7 = vsel %vm622_vm5, %v2960_v16, 0.0  ;;  %v2959_v36 = vmul.f32 %v2922_v24, %v5630_v5  ;;  %v2980_v5 = vadd.f32 %v2979_v50, %v2978_v33 }
 0x2cd   : > { %v2986_v2 = vrot.slane %v2985_v63, 4  ;;  %v2920_v12 = vpop.permute.xlu1 %2919  ;;  %v2997_v21 = vrot.slane %v2996_v48, 2  ;;  %v2972_v17 = vrot.slane %v2971_v52, 1 }
 0x2ce   : > { %v3010_v6 = vsel %vm622_vm5, %v2959_v36, 0.0  ;;  %v2958_v1 = vmul.f32 %v2920_v12, %v5657_v26  ;;  %v2981_v62 = vrot.slane %v2980_v5, 1 }
 0x2cf   : > { %v2987_v53 = vadd.f32 %v2986_v2, %v2985_v63  ;;  %v3012_v3 = vadd.f32 %v3011_v7, %v3010_v6  ;;  %v2918_v0 = vpop.permute.xlu0 %2917  ;;  %v2998_v61 = vadd.f32 %v2997_v21, %v2996_v48  ;;  %v2973_v8 = vadd.f32 %v2972_v17, %v2971_v52 }
 0x2d0   : > { %v3002_v55 = vsel %vm622_vm5, %v2958_v1, 0.0  ;;  %v2957_v13 = vmul.f32 %v2918_v0, %v5641_v47  ;;  %v2982_v57 = vadd.f32 %v2981_v62, %v2980_v5 }
 0x2d1   : > { %v2988_v37 = vrot.slane %v2987_v53, 2  ;;  %v3013_v56 = vrot.slane %v3012_v3, 4  ;;  %v2928_v30 = vpop.permute.xlu1 %2927  ;;  %v2999_v40 = vrot.slane %v2998_v61, 1 }
 0x2d2   : > { %v3001_v29 = vsel %vm622_vm5, %v2957_v13, 0.0  ;;  %v2962_v59 = vmul.f32 %v2928_v30, %v5698_v41  ;;  %v3219_v42 = vsel %vm3125_vm9, %v2982_v57, %v2973_v8  ;;  %v3308_v30 = vld [vmem:[%s5925_s6 + $0x8] sm:$0xff] }
 0x2d3   : > { %v3003_v27 = vadd.f32 %v3002_v55, %v3001_v29  ;;  %v2926_v26 = vpop.permute.xlu0 %2925  ;;  %v2989_v18 = vadd.f32 %v2988_v37, %v2987_v53  ;;  %v3014_v51 = vadd.f32 %v3013_v56, %v3012_v3  ;;  %v3000_v24 = vadd.f32 %v2999_v40, %v2998_v61  ;;  %v3307_v56 = vld [vmem:[%s5925_s6] sm:$0xff]  ;;  %v3309_v29 = vld [vmem:[%s5925_s6 + $0x10] sm:$0xff] }
 0x2d4   : > { %v3020_v22 = vsel %vm622_vm5, %v2962_v59, 0.0  ;;  %v2961_v9 = vmul.f32 %v2926_v26, %v5679_v44  ;;  %v6147_v55 = vmov 0.0   ;;  %v4022_v5 = vpack.c.bf16 %v3308_v30, %v3307_v56  ;;  %v3310_v59 = vld [vmem:[%s5925_s6 + $0x18] sm:$0xff]  ;;  %v3686_v26 = vld [vmem:[%s5924_s5] ss:$0 sm:$0xff] }
 0x2d5   : > { %v3004_v14 = vrot.slane %v3003_v27, 4  ;;  %v2932_v47 = vpop.permute.xlu1 %2931  ;;  %v2990_v20 = vrot.slane %v2989_v18, 1  ;;  %v3015_v25 = vrot.slane %v3014_v51, 2  ;;  %v4025_v52 = vpack.c.bf16 %v3310_v59, %v3309_v29 }
 0x2d6   : > { %v3019_v38 = vsel %vm622_vm5, %v2961_v9, 0.0  ;;  %v2964_v43 = vmul.f32 %v2932_v47, %v5695_v46 }
 0x2d7   : > { %v3005_v10 = vadd.f32 %v3004_v14, %v3003_v27  ;;  %v3021_v41 = vadd.f32 %v3020_v22, %v3019_v38  ;;  %v2930_v60 = vpop.permute.xlu0 %2929  ;;  %v2991_v28 = vadd.f32 %v2990_v20, %v2989_v18  ;;  %v3016_v19 = vadd.f32 %v3015_v25, %v3014_v51 }
 0x2d8   : > { %v3029_v34 = vsel %vm622_vm5, %v2964_v43, 0.0  ;;  %v2963_v39 = vmul.f32 %v2930_v60, %v5668_v23 }
 0x2d9   : > { %v3006_v44 = vrot.slane %v3005_v10, 2  ;;  %v3022_v4 = vrot.slane %v3021_v41, 4  ;;  %v3220_v58 = vsel %vm3127_vm10, %v2991_v28, %v3219_v42  ;;  %v3017_v31 = vrot.slane %v3016_v19, 1 }
 0x2da   : > { %v3028_v49 = vsel %vm622_vm5, %v2963_v39, 0.0  ;;  %v3221_v12 = vsel %vm3129_vm12, %v3000_v24, %v3220_v58 }
 0x2db   : > { %v3007_v15 = vadd.f32 %v3006_v44, %v3005_v10  ;;  %v3023_v45 = vadd.f32 %v3022_v4, %v3021_v41  ;;  %v3030_v46 = vadd.f32 %v3029_v34, %v3028_v49  ;;  %v3018_v1 = vadd.f32 %v3017_v31, %v3016_v19 }
 0x2dd   : > { %v3008_v32 = vrot.slane %v3007_v15, 1  ;;  %v3024_v35 = vrot.slane %v3023_v45, 2  ;;  %v3031_v33 = vrot.slane %v3030_v46, 4 }
 0x2df   : > { %v3025_v16 = vadd.f32 %v3024_v35, %v3023_v45  ;;  %v3032_v23 = vadd.f32 %v3031_v33, %v3030_v46  ;;  %v3009_v63 = vadd.f32 %v3008_v32, %v3007_v15 }
 0x2e1   : > { %v3026_v7 = vrot.slane %v3025_v16, 1  ;;  %v3033_v36 = vrot.slane %v3032_v23, 2  ;;  %v3222_v6 = vsel %vm1986_vm11, %v3009_v63, %v3221_v12  ;;  %vm3391_vm11 = vcmask 7168  }
 0x2e2   : > { %v3223_v3 = vsel %vm3133_vm13, %v3018_v1, %v3222_v6 }
 0x2e3   : > { %v3034_v2 = vadd.f32 %v3033_v36, %v3032_v23  ;;  %v3027_v50 = vadd.f32 %v3026_v7, %v3025_v16 }
 0x2e5   : > { %v3035_v11 = vrot.slane %v3034_v2, 1  ;;  %v3224_v0 = vsel %vm3135_vm14, %v3027_v50, %v3223_v3 }
 0x2e7   : > { %v3036_v53 = vadd.f32 %v3035_v11, %v3034_v2 }
 0x2e9   : > { %v3225_v48 = vsel %vm3137_vm15, %v3036_v53, %v3224_v0 }
 0x2ea   : > { %3996 = vmatmul.mubr.msk.f32.vlgmr.msra.gmra.mrb[18].mxu1 %vm622_vm5, %v3225_v48 }
 0x2eb   : > { %4006 = vmatprep.mubr.msk.f32.mxu1 %vm4458_vm7, %v6147_v55  ;;  %4023 = vmatpush3.bf16.msra.mxu1 %v4022_v5 }
 0x2ec   : > { %4024 = vmatprep.subr.bf16.mxu1 %v6146_v54  ;;  %v3687_v54 = vld [vmem:[#allocation2] ss:$0 sm:$0xff] }
 0x2ef   : > { %4026 = vmatpush3.bf16.msra.mxu1 %v4025_v52 }
 0x2fb   : > { %v3207_v13 = vpop.f32.mrb[16].mxu1 }
 0x2fc   : > { %v3986_v37 = vpop.f32.mrb[17].mxu1 }
 0x3bd   : > { %v3294_v27 = vpop.f32.mrb[18].mxu1 }
 0x3be   : > { %v3295_v21 = vadd.f32 %v3294_v27, %v3207_v13  ;;  %v3997_v18 = vpop.f32.mrb[19].mxu1 }
 0x3c0   : > { %v3305_v22 = vadd.f32 %v3686_v26, %v3295_v21 }
 0x3c2   : > { %v3306_v9 = vmax.f32 %v3305_v22, 0.0 }
 0x3c4   : > { %4007 = vmatmul.mubr.msk.f32.vlgmr.msra.gmra.mrb[20].mxu1 %vm622_vm5, %v3306_v9 }
 0x497   : > { %v3387_v51 = vpop.f32.mrb[20].mxu1 }
 0x498   : > { %v3388_v14 = vadd.f32 %v3687_v54, %v3387_v51  ;;  %v4008_v47 = vpop.f32.mrb[21].mxu1 }
 0x49a   : > { %3392 = vst.msk [vmem:[%s356_s24] sm:$0xff] %vm3391_vm11, %v3388_v14 }
 0x49b PF: > { %s6148_s10 = smov %s4605_s29  ;;  %p21_p9 = scmp.ge.s32.totalorder %s4605_s29, 4  }
 0x49c   : > { %s6149_s29 = smov %s4440_s30  ;;  %s6150_s30 = smov %s4444_s9 }
 0x49d   : > { %s6151_s9 = smov %s4614_s18  ;;  %23 = sbr.rel (!%p21_p9) target bundleno = 7 (0x7), region = 108 }
 0x4a4   :  { %3412 = vsyncpa [#allocation4], 1 }
 0x4a5   :  { %3414 = vsyncpa [#allocation4 + $0x1], 1 }
 0x4a6   :  { %3415 = vsyncpa [#allocation6], 1 }

</bundles_post_ra>
